<compile_context>
chip_gen: v6e
topology: v6e:2x2x1
jax: 0.10.0
libtpu: 0.0.40
codegen_flags: <defaults>
</compile_context>

<pallas_src>
import functools

import jax
import jax.numpy as jnp
from jax.experimental import pallas as pl
from jax.experimental.pallas import tpu as pltpu


def _make_kernel(batch_tile, seq, dim, heads, num_layers, compute_dtype):
    head_dim = dim // heads
    scale = 1.0 / float(head_dim) ** 0.5
    eps = 1e-5
    f32 = jnp.float32
    cd = compute_dtype
    rows = batch_tile * seq

    def layer_norm(x, w, b):
        mu = jnp.mean(x, axis=-1, keepdims=True)
        var = jnp.mean((x - mu) ** 2, axis=-1, keepdims=True)
        return (x - mu) * jax.lax.rsqrt(var + eps) * w + b

    def kernel(verb_ref, inst_ref, targ_ref,
               wv_ref, wi_ref, wt_ref, embb_ref,
               qkvw_ref, outw_ref, l1w_ref, l2w_ref, vecs_ref,
               out_ref):
        # ---- block-diagonal batch mask, built in-kernel (no (rows,rows) HBM input).
        # Component-major rows: row r belongs to batch element (r % batch_tile);
        # tokens only attend within their own batch element.
        rid = jax.lax.broadcasted_iota(jnp.int32, (rows, rows), 0)
        cid = jax.lax.broadcasted_iota(jnp.int32, (rows, rows), 1)
        mask = jnp.where((rid % batch_tile) == (cid % batch_tile),
                         0.0, -1e30).astype(f32)

        # ---- component embeddings -> component-major token matrix (rows, dim).
        # rows [0:bt) = verb, [bt:2bt) = instrument, [2bt:3bt) = target.
        emb_b = embb_ref[...]                                      # (3, dim) f32
        verb_emb = jnp.dot(verb_ref[...].astype(cd), wv_ref[...],
                           preferred_element_type=f32) + emb_b[0:1, :]
        inst_emb = jnp.dot(inst_ref[...].astype(cd), wi_ref[...],
                           preferred_element_type=f32) + emb_b[1:2, :]
        targ_emb = jnp.dot(targ_ref[...].astype(cd), wt_ref[...],
                           preferred_element_type=f32) + emb_b[2:3, :]
        # One tile-aligned sublane concatenate per batch tile (x is a value carry
        # across the unrolled layer loop; no per-layer scratch round trips).
        x = jnp.concatenate([verb_emb, inst_emb, targ_emb], axis=0)

        # ---- num_layers x post-norm encoder layer, fully unrolled, weights resident.
        for l in range(num_layers):
            vec = vecs_ref[l]                                      # (8, 4*dim) f32 slab
            qkvb = vec[0:1, :3 * dim]
            outb = vec[1:2, :dim]
            l1b = vec[2:3, :4 * dim]
            l2b = vec[3:4, :dim]
            n1w, n1b = vec[4:5, :dim], vec[5:6, :dim]
            n2w, n2b = vec[6:7, :dim], vec[7:8, :dim]

            # multi-head self-attention over the whole batch tile at once.
            qkv = jnp.dot(x.astype(cd), qkvw_ref[l],
                          preferred_element_type=f32) + qkvb
            q = (qkv[:, 0 * dim:1 * dim] * scale).astype(cd)       # scale folded once
            k = qkv[:, 1 * dim:2 * dim].astype(cd)
            v = qkv[:, 2 * dim:3 * dim].astype(cd)

            outw = outw_ref[l]                                     # (dim, dim) bf16
            attn = jnp.zeros((rows, dim), f32)
            for h in range(heads):
                lo = h * head_dim
                qh = q[:, lo:lo + head_dim]
                kh = k[:, lo:lo + head_dim]
                vh = v[:, lo:lo + head_dim]
                s = jax.lax.dot_general(qh, kh, (((1,), (1,)), ((), ())),
                                        preferred_element_type=f32) + mask
                s = s - jnp.max(s, axis=-1, keepdims=True)
                p = jnp.exp(s)
                # EUP approx reciprocal; use approx=False if bit-level parity
                # with torch.softmax is required.
                p = p * pl.reciprocal(jnp.sum(p, axis=-1, keepdims=True),
                                      approx=True)
                ctx = jnp.dot(p.astype(cd), vh, preferred_element_type=f32)
                # output projection folded into the head loop (no lane concat).
                attn = attn + jnp.dot(ctx.astype(cd), outw[lo:lo + head_dim, :],
                                      preferred_element_type=f32)
            x = layer_norm(x + attn + outb, n1w, n1b)

            # feed-forward (Linear -> ReLU -> Linear), post-norm residual.
            hid = jnp.dot(x.astype(cd), l1w_ref[l],
                          preferred_element_type=f32) + l1b
            hid = jnp.maximum(hid, 0.0)
            ffn = jnp.dot(hid.astype(cd), l2w_ref[l],
                          preferred_element_type=f32) + l2b
            x = layer_norm(x + ffn, n2w, n2b)

        # ---- store this batch tile; output layout is component-major (seq, bt, dim).
        if batch_tile % 8 == 0:
            out_ref[...] = x.reshape(seq, batch_tile, dim)         # free sublane split
        else:
            for c in range(seq):
                out_ref[c] = x[c * batch_tile:(c + 1) * batch_tile, :]

    return kernel


def init_params(key, feature_dims, common_dim, num_layers,
                weight_dtype=jnp.bfloat16):
    """Deterministic synthetic parameters, pre-packed into the kernel layout.

    Matmul weights are (in_features, out_features), stored in `weight_dtype`
    (bf16 halves HBM->VMEM bytes and hits the bf16-native MXU).  The 8 tiny
    per-layer bias/LayerNorm vectors are packed into one (num_layers, 8, 4*dim)
    f32 slab (one DMA instead of 8 padded ones):
        row 0: qkv bias (3*dim)     row 1: attn-out bias (dim)
        row 2: ffn1 bias (4*dim)    row 3: ffn2 bias (dim)
        row 4: norm1 weight (dim)   row 5: norm1 bias (dim)
        row 6: norm2 weight (dim)   row 7: norm2 bias (dim)
    """
    d = common_dim
    keys = iter(jax.random.split(key, 32))

    def w(shape, s=0.02):
        return jax.random.normal(next(keys), shape, jnp.float32) * s

    vecs = jnp.zeros((num_layers, 8, 4 * d), jnp.float32)
    vecs = vecs.at[:, 0, :3 * d].set(w((num_layers, 3 * d)))    # qkv bias
    vecs = vecs.at[:, 1, :d].set(w((num_layers, d)))            # out-proj bias
    vecs = vecs.at[:, 2, :4 * d].set(w((num_layers, 4 * d)))    # ffn linear1 bias
    vecs = vecs.at[:, 3, :d].set(w((num_layers, d)))            # ffn linear2 bias
    vecs = vecs.at[:, 4, :d].set(1.0)                           # norm1 weight
    vecs = vecs.at[:, 6, :d].set(1.0)                           # norm2 weight
    # rows 5 and 7 (LayerNorm biases) stay zero.

    emb_b = jnp.stack([w((d,)), w((d,)), w((d,))], axis=0)      # (3, dim): verb/inst/targ

    return {
        "wv": w((feature_dims["verb"], d)).astype(weight_dtype),
        "wi": w((feature_dims["instrument"], d)).astype(weight_dtype),
        "wt": w((feature_dims["target"], d)).astype(weight_dtype),
        "emb_b": emb_b,
        "qkvw": w((num_layers, d, 3 * d)).astype(weight_dtype),
        "outw": w((num_layers, d, d)).astype(weight_dtype),
        "l1w": w((num_layers, d, 4 * d)).astype(weight_dtype),
        "l2w": w((num_layers, 4 * d, d)).astype(weight_dtype),
        "vecs": vecs,
    }


def _default_batch_tile(batch):
    # Prefer >=2 tiles (v7x shards the "parallel" axis over 2 TensorCores),
    # a multiple of 8 (sublane tiling), capped at 128 so rows = 3*bt is
    # lane-dense (384) while the O(rows^2) score/mask work stays bounded.
    for cand in (128, 64, 32, 16, 8):
        if cand <= batch // 2 and batch % cand == 0:
            return cand
    return batch


@functools.partial(jax.jit, static_argnames=("num_heads", "batch_tile"))
def attention_module_forward(verb_feat, inst_feat, target_feat, params,
                             *, num_heads, batch_tile=None):
    batch = verb_feat.shape[0]
    seq = 3
    num_layers, dim = params["qkvw"].shape[0], params["qkvw"].shape[1]
    assert dim % num_heads == 0, "common_dim must be divisible by num_heads"

    if batch_tile is None:
        batch_tile = _default_batch_tile(batch)
    assert batch % batch_tile == 0, "batch must be divisible by batch_tile"
    assert batch_tile == batch or batch_tile % 8 == 0, \
        "batch_tile must be the full batch or a multiple of 8 (sublane tiling)"
    n_bt = batch // batch_tile

    fv, fi, ft = verb_feat.shape[1], inst_feat.shape[1], target_feat.shape[1]

    kernel = _make_kernel(batch_tile, seq, dim, num_heads, num_layers,
                          compute_dtype=params["qkvw"].dtype)

    def rep(shape):          # resident across all grid steps (weights / slabs)
        return pl.BlockSpec(shape, lambda b: (0,) * len(shape))

    def per_batch(shape):    # tiled along the (parallel) batch grid axis
        return pl.BlockSpec(shape, lambda b: (b,) + (0,) * (len(shape) - 1))

    in_specs = [
        per_batch((batch_tile, fv)),
        per_batch((batch_tile, fi)),
        per_batch((batch_tile, ft)),
        rep(params["wv"].shape), rep(params["wi"].shape), rep(params["wt"].shape),
        rep(params["emb_b"].shape),
        rep(params["qkvw"].shape), rep(params["outw"].shape),
        rep(params["l1w"].shape), rep(params["l2w"].shape),
        rep(params["vecs"].shape),
    ]

    args = (verb_feat, inst_feat, target_feat,
            params["wv"], params["wi"], params["wt"], params["emb_b"],
            params["qkvw"], params["outw"], params["l1w"], params["l2w"],
            params["vecs"])

    # TODO(synk): for configs whose stacked weights do not fit comfortably in VMEM
    # (very large dim * num_layers on v7x's 64 MiB), fall back to a per-layer
    # streamed grid axis instead of this resident-weights path.

    out = pl.pallas_call(
        kernel,
        out_shape=jax.ShapeDtypeStruct((seq, batch, dim), jnp.float32),
        grid_spec=pltpu.PrefetchScalarGridSpec(
            num_scalar_prefetch=0,
            grid=(n_bt,),                                          # batch tiles only
            in_specs=in_specs,
            out_specs=pl.BlockSpec((seq, batch_tile, dim), lambda b: (0, b, 0)),
        ),
        compiler_params=pltpu.CompilerParams(
            dimension_semantics=("parallel",),
            # above the 32 MiB scoped default, headroom under v7x's 64 MiB VMEM.
            vmem_limit_bytes=48 * 1024 * 1024,
        ),
    )(*args)

    # (seq, batch, dim) -> (batch, seq, dim) -> (batch, seq*dim); per batch element
    # the token order is [verb, instrument, target], matching the PyTorch module.
    return jnp.transpose(out, (1, 0, 2)).reshape(batch, -1)


if __name__ == "__main__":
    # Small shapes consistent with the module (common_dim scaled down to 32).
    feature_dims = {"verb": 12, "instrument": 8, "target": 16}
    batch, common_dim, num_heads, num_layers = 16, 32, 4, 2

    root = jax.random.PRNGKey(0)
    k_v, k_i, k_t, k_p = jax.random.split(root, 4)
    verb_feat = jax.random.normal(k_v, (batch, feature_dims["verb"]), jnp.float32)
    inst_feat = jax.random.normal(k_i, (batch, feature_dims["instrument"]), jnp.float32)
    target_feat = jax.random.normal(k_t, (batch, feature_dims["target"]), jnp.float32)

    params = init_params(k_p, feature_dims, common_dim, num_layers)

    # Default batch_tile heuristic picks 8 here -> 2 parallel batch tiles.
    out = attention_module_forward(verb_feat, inst_feat, target_feat, params,
                                   num_heads=num_heads)
    jax.block_until_ready(out)
    assert out.shape == (batch, 3 * common_dim), out.shape
    assert bool(jnp.all(jnp.isfinite(out)))
    print("KERNEL_OK")
</pallas_src>

<mosaic_0001>
module attributes {stable_mosaic.version = 11 : i64} {
  func.func @kernel(%arg0: i32, %arg1: memref<8x12xf32, #tpu.memory_space<vmem>>, %arg2: memref<8x8xf32, #tpu.memory_space<vmem>>, %arg3: memref<8x16xf32, #tpu.memory_space<vmem>>, %arg4: memref<12x32xbf16, #tpu.memory_space<vmem>>, %arg5: memref<8x32xbf16, #tpu.memory_space<vmem>>, %arg6: memref<16x32xbf16, #tpu.memory_space<vmem>>, %arg7: memref<3x32xf32, #tpu.memory_space<vmem>>, %arg8: memref<2x32x96xbf16, #tpu.memory_space<vmem>>, %arg9: memref<2x32x32xbf16, #tpu.memory_space<vmem>>, %arg10: memref<2x32x128xbf16, #tpu.memory_space<vmem>>, %arg11: memref<2x128x32xbf16, #tpu.memory_space<vmem>>, %arg12: memref<2x8x128xf32, #tpu.memory_space<vmem>>, %arg13: memref<3x8x32xf32, #tpu.memory_space<vmem>>) attributes {dimension_semantics = [#tpu.dimension_semantics<parallel>], iteration_bounds = array<i64: 2>, scalar_prefetch = 0 : i64, scratch_operands = 0 : i64, tpu.core_type = #tpu.core_type<tc>, window_params = [{transform_indices = @transform_0, window_bounds = array<i64: 8, 12>}, {transform_indices = @transform_1, window_bounds = array<i64: 8, 8>}, {transform_indices = @transform_2, window_bounds = array<i64: 8, 16>}, {pipeline_mode = #tpu.pipeline_mode<synchronous>, transform_indices = @transform_3, window_bounds = array<i64: 12, 32>}, {pipeline_mode = #tpu.pipeline_mode<synchronous>, transform_indices = @transform_4, window_bounds = array<i64: 8, 32>}, {pipeline_mode = #tpu.pipeline_mode<synchronous>, transform_indices = @transform_5, window_bounds = array<i64: 16, 32>}, {pipeline_mode = #tpu.pipeline_mode<synchronous>, transform_indices = @transform_6, window_bounds = array<i64: 3, 32>}, {pipeline_mode = #tpu.pipeline_mode<synchronous>, transform_indices = @transform_7, window_bounds = array<i64: 2, 32, 96>}, {pipeline_mode = #tpu.pipeline_mode<synchronous>, transform_indices = @transform_8, window_bounds = array<i64: 2, 32, 32>}, {pipeline_mode = #tpu.pipeline_mode<synchronous>, transform_indices = @transform_9, window_bounds = array<i64: 2, 32, 128>}, {pipeline_mode = #tpu.pipeline_mode<synchronous>, transform_indices = @transform_10, window_bounds = array<i64: 2, 128, 32>}, {pipeline_mode = #tpu.pipeline_mode<synchronous>, transform_indices = @transform_11, window_bounds = array<i64: 2, 8, 128>}, {transform_indices = @transform_12, window_bounds = array<i64: 3, 8, 32>}]} {
    %0 = tpu.iota {dimensions = array<i32: 0>} : vector<24x24xi32>
    %1 = tpu.iota {dimensions = array<i32: 1>} : vector<24x24xi32>
    %c8_i32 = arith.constant 8 : i32
    %c0_i32 = arith.constant 0 : i32
    %2 = arith.cmpi eq, %c8_i32, %c0_i32 : i32
    %c1_i32 = arith.constant 1 : i32
    %3 = arith.select %2, %c1_i32, %c8_i32 : i32
    %4 = vector.broadcast %3 : i32 to vector<24x24xi32>
    %5 = arith.remsi %0, %4 : vector<24x24xi32>
    %c0_i32_0 = arith.constant 0 : i32
    %6 = vector.broadcast %c0_i32_0 : i32 to vector<24x24xi32>
    %7 = arith.cmpi ne, %5, %6 : vector<24x24xi32>
    %c0_i32_1 = arith.constant 0 : i32
    %8 = vector.broadcast %c0_i32_1 : i32 to vector<24x24xi32>
    %9 = arith.cmpi slt, %5, %8 : vector<24x24xi32>
    %c0_i32_2 = arith.constant 0 : i32
    %10 = arith.cmpi slt, %3, %c0_i32_2 : i32
    %11 = vector.broadcast %10 : i1 to vector<24x24xi1>
    %12 = vector.broadcast %11 : vector<24x24xi1> to vector<24x24xi1>
    %13 = arith.xori %9, %12 : vector<24x24xi1>
    %14 = arith.andi %13, %7 : vector<24x24xi1>
    %15 = vector.broadcast %3 : i32 to vector<24x24xi32>
    %16 = arith.addi %5, %15 : vector<24x24xi32>
    %17 = arith.select %14, %16, %5 : vector<24x24xi1>, vector<24x24xi32>
    %c8_i32_3 = arith.constant 8 : i32
    %c0_i32_4 = arith.constant 0 : i32
    %18 = arith.cmpi eq, %c8_i32_3, %c0_i32_4 : i32
    %c1_i32_5 = arith.constant 1 : i32
    %19 = arith.select %18, %c1_i32_5, %c8_i32_3 : i32
    %20 = vector.broadcast %19 : i32 to vector<24x24xi32>
    %21 = arith.remsi %1, %20 : vector<24x24xi32>
    %c0_i32_6 = arith.constant 0 : i32
    %22 = vector.broadcast %c0_i32_6 : i32 to vector<24x24xi32>
    %23 = arith.cmpi ne, %21, %22 : vector<24x24xi32>
    %c0_i32_7 = arith.constant 0 : i32
    %24 = vector.broadcast %c0_i32_7 : i32 to vector<24x24xi32>
    %25 = arith.cmpi slt, %21, %24 : vector<24x24xi32>
    %c0_i32_8 = arith.constant 0 : i32
    %26 = arith.cmpi slt, %19, %c0_i32_8 : i32
    %27 = vector.broadcast %26 : i1 to vector<24x24xi1>
    %28 = vector.broadcast %27 : vector<24x24xi1> to vector<24x24xi1>
    %29 = arith.xori %25, %28 : vector<24x24xi1>
    %30 = arith.andi %29, %23 : vector<24x24xi1>
    %31 = vector.broadcast %19 : i32 to vector<24x24xi32>
    %32 = arith.addi %21, %31 : vector<24x24xi32>
    %33 = arith.select %30, %32, %21 : vector<24x24xi1>, vector<24x24xi32>
    %34 = arith.cmpi eq, %17, %33 : vector<24x24xi32>
    %cst = arith.constant 0.000000e+00 : f32
    %cst_9 = arith.constant -1.000000e+30 : f32
    %35 = vector.broadcast %cst : f32 to vector<24x24xf32>
    %36 = vector.broadcast %cst_9 : f32 to vector<24x24xf32>
    %37 = arith.select %34, %35, %36 : vector<24x24xi1>, vector<24x24xf32>
    %c0 = arith.constant 0 : index
    %c0_10 = arith.constant 0 : index
    %38 = vector.load %arg7[%c0, %c0_10] : memref<3x32xf32, #tpu.memory_space<vmem>>, vector<3x32xf32>
    %c0_11 = arith.constant 0 : index
    %c0_12 = arith.constant 0 : index
    %39 = vector.load %arg1[%c0_11, %c0_12] : memref<8x12xf32, #tpu.memory_space<vmem>>, vector<8x12xf32>
    %40 = arith.truncf %39 : vector<8x12xf32> to vector<8x12xbf16>
    %c0_13 = arith.constant 0 : index
    %c0_14 = arith.constant 0 : index
    %41 = vector.load %arg4[%c0_13, %c0_14] : memref<12x32xbf16, #tpu.memory_space<vmem>>, vector<12x32xbf16>
    %cst_15 = arith.constant dense<0.000000e+00> : vector<8x32xf32>
    %42 = tpu.matmul %40, %41, %cst_15 {dimension_numbers = #tpu.dot_dimension_numbers<[1], [0], [0], [1], [0, 0, 1, 1], [], []>} : vector<8x12xbf16>, vector<12x32xbf16>, vector<8x32xf32> -> vector<8x32xf32>
    %43 = vector.extract_strided_slice %38 {offsets = [0, 0], sizes = [1, 32], strides = [1, 1]} : vector<3x32xf32> to vector<1x32xf32>
    %44 = vector.broadcast %43 : vector<1x32xf32> to vector<8x32xf32>
    %45 = arith.addf %42, %44 : vector<8x32xf32>
    %c0_16 = arith.constant 0 : index
    %c0_17 = arith.constant 0 : index
    %46 = vector.load %arg2[%c0_16, %c0_17] : memref<8x8xf32, #tpu.memory_space<vmem>>, vector<8x8xf32>
    %47 = arith.truncf %46 : vector<8x8xf32> to vector<8x8xbf16>
    %c0_18 = arith.constant 0 : index
    %c0_19 = arith.constant 0 : index
    %48 = vector.load %arg5[%c0_18, %c0_19] : memref<8x32xbf16, #tpu.memory_space<vmem>>, vector<8x32xbf16>
    %cst_20 = arith.constant dense<0.000000e+00> : vector<8x32xf32>
    %49 = tpu.matmul %47, %48, %cst_20 {dimension_numbers = #tpu.dot_dimension_numbers<[1], [0], [0], [1], [0, 0, 1, 1], [], []>} : vector<8x8xbf16>, vector<8x32xbf16>, vector<8x32xf32> -> vector<8x32xf32>
    %50 = vector.extract_strided_slice %38 {offsets = [1, 0], sizes = [1, 32], strides = [1, 1]} : vector<3x32xf32> to vector<1x32xf32>
    %51 = vector.broadcast %50 : vector<1x32xf32> to vector<8x32xf32>
    %52 = arith.addf %49, %51 : vector<8x32xf32>
    %c0_21 = arith.constant 0 : index
    %c0_22 = arith.constant 0 : index
    %53 = vector.load %arg3[%c0_21, %c0_22] : memref<8x16xf32, #tpu.memory_space<vmem>>, vector<8x16xf32>
    %54 = arith.truncf %53 : vector<8x16xf32> to vector<8x16xbf16>
    %c0_23 = arith.constant 0 : index
    %c0_24 = arith.constant 0 : index
    %55 = vector.load %arg6[%c0_23, %c0_24] : memref<16x32xbf16, #tpu.memory_space<vmem>>, vector<16x32xbf16>
    %cst_25 = arith.constant dense<0.000000e+00> : vector<8x32xf32>
    %56 = tpu.matmul %54, %55, %cst_25 {dimension_numbers = #tpu.dot_dimension_numbers<[1], [0], [0], [1], [0, 0, 1, 1], [], []>} : vector<8x16xbf16>, vector<16x32xbf16>, vector<8x32xf32> -> vector<8x32xf32>
    %57 = vector.extract_strided_slice %38 {offsets = [2, 0], sizes = [1, 32], strides = [1, 1]} : vector<3x32xf32> to vector<1x32xf32>
    %58 = vector.broadcast %57 : vector<1x32xf32> to vector<8x32xf32>
    %59 = arith.addf %56, %58 : vector<8x32xf32>
    %60 = tpu.concatenate %45, %52, %59 in 0 : vector<8x32xf32>, vector<8x32xf32>, vector<8x32xf32> -> vector<24x32xf32>
    %c0_26 = arith.constant 0 : index
    %c0_27 = arith.constant 0 : index
    %c0_28 = arith.constant 0 : index
    %61 = vector.load %arg12[%c0_26, %c0_27, %c0_28] : memref<2x8x128xf32, #tpu.memory_space<vmem>>, vector<1x8x128xf32>
    %62 = vector.shape_cast %61 : vector<1x8x128xf32> to vector<8x128xf32>
    %63 = vector.extract_strided_slice %62 {offsets = [0, 0], sizes = [1, 96], strides = [1, 1]} : vector<8x128xf32> to vector<1x96xf32>
    %64 = vector.extract_strided_slice %62 {offsets = [1, 0], sizes = [1, 32], strides = [1, 1]} : vector<8x128xf32> to vector<1x32xf32>
    %65 = vector.extract_strided_slice %62 {offsets = [2, 0], sizes = [1, 128], strides = [1, 1]} : vector<8x128xf32> to vector<1x128xf32>
    %66 = vector.extract_strided_slice %62 {offsets = [3, 0], sizes = [1, 32], strides = [1, 1]} : vector<8x128xf32> to vector<1x32xf32>
    %67 = vector.extract_strided_slice %62 {offsets = [4, 0], sizes = [1, 32], strides = [1, 1]} : vector<8x128xf32> to vector<1x32xf32>
    %68 = vector.extract_strided_slice %62 {offsets = [5, 0], sizes = [1, 32], strides = [1, 1]} : vector<8x128xf32> to vector<1x32xf32>
    %69 = vector.extract_strided_slice %62 {offsets = [6, 0], sizes = [1, 32], strides = [1, 1]} : vector<8x128xf32> to vector<1x32xf32>
    %70 = vector.extract_strided_slice %62 {offsets = [7, 0], sizes = [1, 32], strides = [1, 1]} : vector<8x128xf32> to vector<1x32xf32>
    %71 = arith.truncf %60 : vector<24x32xf32> to vector<24x32xbf16>
    %c0_29 = arith.constant 0 : index
    %c0_30 = arith.constant 0 : index
    %c0_31 = arith.constant 0 : index
    %72 = vector.load %arg8[%c0_29, %c0_30, %c0_31] : memref<2x32x96xbf16, #tpu.memory_space<vmem>>, vector<1x32x96xbf16>
    %73 = vector.shape_cast %72 : vector<1x32x96xbf16> to vector<32x96xbf16>
    %cst_32 = arith.constant dense<0.000000e+00> : vector<24x96xf32>
    %74 = tpu.matmul %71, %73, %cst_32 {dimension_numbers = #tpu.dot_dimension_numbers<[1], [0], [0], [1], [0, 0, 1, 1], [], []>} : vector<24x32xbf16>, vector<32x96xbf16>, vector<24x96xf32> -> vector<24x96xf32>
    %75 = vector.broadcast %63 : vector<1x96xf32> to vector<24x96xf32>
    %76 = arith.addf %74, %75 : vector<24x96xf32>
    %77 = vector.extract_strided_slice %76 {offsets = [0, 0], sizes = [24, 32], strides = [1, 1]} : vector<24x96xf32> to vector<24x32xf32>
    %cst_33 = arith.constant 0.353553385 : f32
    %78 = vector.broadcast %cst_33 : f32 to vector<24x32xf32>
    %79 = arith.mulf %77, %78 : vector<24x32xf32>
    %80 = arith.truncf %79 : vector<24x32xf32> to vector<24x32xbf16>
    %81 = vector.extract_strided_slice %76 {offsets = [0, 32], sizes = [24, 32], strides = [1, 1]} : vector<24x96xf32> to vector<24x32xf32>
    %82 = arith.truncf %81 : vector<24x32xf32> to vector<24x32xbf16>
    %83 = vector.extract_strided_slice %76 {offsets = [0, 64], sizes = [24, 32], strides = [1, 1]} : vector<24x96xf32> to vector<24x32xf32>
    %84 = arith.truncf %83 : vector<24x32xf32> to vector<24x32xbf16>
    %c0_34 = arith.constant 0 : index
    %c0_35 = arith.constant 0 : index
    %c0_36 = arith.constant 0 : index
    %85 = vector.load %arg9[%c0_34, %c0_35, %c0_36] : memref<2x32x32xbf16, #tpu.memory_space<vmem>>, vector<1x32x32xbf16>
    %86 = vector.shape_cast %85 : vector<1x32x32xbf16> to vector<32x32xbf16>
    %cst_37 = arith.constant 0.000000e+00 : f32
    %87 = vector.broadcast %cst_37 : f32 to vector<24x32xf32>
    %88 = vector.extract_strided_slice %80 {offsets = [0, 0], sizes = [24, 8], strides = [1, 1]} : vector<24x32xbf16> to vector<24x8xbf16>
    %89 = vector.extract_strided_slice %82 {offsets = [0, 0], sizes = [24, 8], strides = [1, 1]} : vector<24x32xbf16> to vector<24x8xbf16>
    %90 = vector.extract_strided_slice %84 {offsets = [0, 0], sizes = [24, 8], strides = [1, 1]} : vector<24x32xbf16> to vector<24x8xbf16>
    %cst_38 = arith.constant dense<0.000000e+00> : vector<24x24xf32>
    %91 = tpu.matmul %88, %89, %cst_38 {dimension_numbers = #tpu.dot_dimension_numbers<[1], [1], [0], [0], [0, 0, 1, 0], [], []>} : vector<24x8xbf16>, vector<24x8xbf16>, vector<24x24xf32> -> vector<24x24xf32>
    %92 = arith.addf %91, %37 : vector<24x24xf32>
    %cst_39 = arith.constant dense<0xFF800000> : vector<24xf32>
    %93 = vector.multi_reduction <maximumf>, %92, %cst_39 [1] : vector<24x24xf32> to vector<24xf32>
    %94 = vector.shape_cast %93 : vector<24xf32> to vector<24x1xf32>
    %95 = vector.broadcast %94 : vector<24x1xf32> to vector<24x24xf32>
    %96 = arith.subf %92, %95 : vector<24x24xf32>
    %97 = math.exp %96 : vector<24x24xf32>
    %cst_40 = arith.constant dense<0.000000e+00> : vector<24xf32>
    %98 = vector.multi_reduction <add>, %97, %cst_40 [1] : vector<24x24xf32> to vector<24xf32>
    %99 = vector.shape_cast %98 : vector<24xf32> to vector<24x1xf32>
    %100 = tpu.reciprocal %99 {approx = true} : vector<24x1xf32> -> vector<24x1xf32>
    %101 = vector.broadcast %100 : vector<24x1xf32> to vector<24x24xf32>
    %102 = arith.mulf %97, %101 : vector<24x24xf32>
    %103 = arith.truncf %102 : vector<24x24xf32> to vector<24x24xbf16>
    %cst_41 = arith.constant dense<0.000000e+00> : vector<24x8xf32>
    %104 = tpu.matmul %103, %90, %cst_41 {dimension_numbers = #tpu.dot_dimension_numbers<[1], [0], [0], [1], [0, 0, 1, 1], [], []>} : vector<24x24xbf16>, vector<24x8xbf16>, vector<24x8xf32> -> vector<24x8xf32>
    %105 = arith.truncf %104 : vector<24x8xf32> to vector<24x8xbf16>
    %106 = vector.extract_strided_slice %86 {offsets = [0, 0], sizes = [8, 32], strides = [1, 1]} : vector<32x32xbf16> to vector<8x32xbf16>
    %cst_42 = arith.constant dense<0.000000e+00> : vector<24x32xf32>
    %107 = tpu.matmul %105, %106, %cst_42 {dimension_numbers = #tpu.dot_dimension_numbers<[1], [0], [0], [1], [0, 0, 1, 1], [], []>} : vector<24x8xbf16>, vector<8x32xbf16>, vector<24x32xf32> -> vector<24x32xf32>
    %108 = arith.addf %87, %107 : vector<24x32xf32>
    %109 = vector.extract_strided_slice %80 {offsets = [0, 8], sizes = [24, 8], strides = [1, 1]} : vector<24x32xbf16> to vector<24x8xbf16>
    %110 = vector.extract_strided_slice %82 {offsets = [0, 8], sizes = [24, 8], strides = [1, 1]} : vector<24x32xbf16> to vector<24x8xbf16>
    %111 = vector.extract_strided_slice %84 {offsets = [0, 8], sizes = [24, 8], strides = [1, 1]} : vector<24x32xbf16> to vector<24x8xbf16>
    %cst_43 = arith.constant dense<0.000000e+00> : vector<24x24xf32>
    %112 = tpu.matmul %109, %110, %cst_43 {dimension_numbers = #tpu.dot_dimension_numbers<[1], [1], [0], [0], [0, 0, 1, 0], [], []>} : vector<24x8xbf16>, vector<24x8xbf16>, vector<24x24xf32> -> vector<24x24xf32>
    %113 = arith.addf %112, %37 : vector<24x24xf32>
    %cst_44 = arith.constant dense<0xFF800000> : vector<24xf32>
    %114 = vector.multi_reduction <maximumf>, %113, %cst_44 [1] : vector<24x24xf32> to vector<24xf32>
    %115 = vector.shape_cast %114 : vector<24xf32> to vector<24x1xf32>
    %116 = vector.broadcast %115 : vector<24x1xf32> to vector<24x24xf32>
    %117 = arith.subf %113, %116 : vector<24x24xf32>
    %118 = math.exp %117 : vector<24x24xf32>
    %cst_45 = arith.constant dense<0.000000e+00> : vector<24xf32>
    %119 = vector.multi_reduction <add>, %118, %cst_45 [1] : vector<24x24xf32> to vector<24xf32>
    %120 = vector.shape_cast %119 : vector<24xf32> to vector<24x1xf32>
    %121 = tpu.reciprocal %120 {approx = true} : vector<24x1xf32> -> vector<24x1xf32>
    %122 = vector.broadcast %121 : vector<24x1xf32> to vector<24x24xf32>
    %123 = arith.mulf %118, %122 : vector<24x24xf32>
    %124 = arith.truncf %123 : vector<24x24xf32> to vector<24x24xbf16>
    %cst_46 = arith.constant dense<0.000000e+00> : vector<24x8xf32>
    %125 = tpu.matmul %124, %111, %cst_46 {dimension_numbers = #tpu.dot_dimension_numbers<[1], [0], [0], [1], [0, 0, 1, 1], [], []>} : vector<24x24xbf16>, vector<24x8xbf16>, vector<24x8xf32> -> vector<24x8xf32>
    %126 = arith.truncf %125 : vector<24x8xf32> to vector<24x8xbf16>
    %127 = vector.extract_strided_slice %86 {offsets = [8, 0], sizes = [8, 32], strides = [1, 1]} : vector<32x32xbf16> to vector<8x32xbf16>
    %cst_47 = arith.constant dense<0.000000e+00> : vector<24x32xf32>
    %128 = tpu.matmul %126, %127, %cst_47 {dimension_numbers = #tpu.dot_dimension_numbers<[1], [0], [0], [1], [0, 0, 1, 1], [], []>} : vector<24x8xbf16>, vector<8x32xbf16>, vector<24x32xf32> -> vector<24x32xf32>
    %129 = arith.addf %108, %128 : vector<24x32xf32>
    %130 = vector.extract_strided_slice %80 {offsets = [0, 16], sizes = [24, 8], strides = [1, 1]} : vector<24x32xbf16> to vector<24x8xbf16>
    %131 = vector.extract_strided_slice %82 {offsets = [0, 16], sizes = [24, 8], strides = [1, 1]} : vector<24x32xbf16> to vector<24x8xbf16>
    %132 = vector.extract_strided_slice %84 {offsets = [0, 16], sizes = [24, 8], strides = [1, 1]} : vector<24x32xbf16> to vector<24x8xbf16>
    %cst_48 = arith.constant dense<0.000000e+00> : vector<24x24xf32>
    %133 = tpu.matmul %130, %131, %cst_48 {dimension_numbers = #tpu.dot_dimension_numbers<[1], [1], [0], [0], [0, 0, 1, 0], [], []>} : vector<24x8xbf16>, vector<24x8xbf16>, vector<24x24xf32> -> vector<24x24xf32>
    %134 = arith.addf %133, %37 : vector<24x24xf32>
    %cst_49 = arith.constant dense<0xFF800000> : vector<24xf32>
    %135 = vector.multi_reduction <maximumf>, %134, %cst_49 [1] : vector<24x24xf32> to vector<24xf32>
    %136 = vector.shape_cast %135 : vector<24xf32> to vector<24x1xf32>
    %137 = vector.broadcast %136 : vector<24x1xf32> to vector<24x24xf32>
    %138 = arith.subf %134, %137 : vector<24x24xf32>
    %139 = math.exp %138 : vector<24x24xf32>
    %cst_50 = arith.constant dense<0.000000e+00> : vector<24xf32>
    %140 = vector.multi_reduction <add>, %139, %cst_50 [1] : vector<24x24xf32> to vector<24xf32>
    %141 = vector.shape_cast %140 : vector<24xf32> to vector<24x1xf32>
    %142 = tpu.reciprocal %141 {approx = true} : vector<24x1xf32> -> vector<24x1xf32>
    %143 = vector.broadcast %142 : vector<24x1xf32> to vector<24x24xf32>
    %144 = arith.mulf %139, %143 : vector<24x24xf32>
    %145 = arith.truncf %144 : vector<24x24xf32> to vector<24x24xbf16>
    %cst_51 = arith.constant dense<0.000000e+00> : vector<24x8xf32>
    %146 = tpu.matmul %145, %132, %cst_51 {dimension_numbers = #tpu.dot_dimension_numbers<[1], [0], [0], [1], [0, 0, 1, 1], [], []>} : vector<24x24xbf16>, vector<24x8xbf16>, vector<24x8xf32> -> vector<24x8xf32>
    %147 = arith.truncf %146 : vector<24x8xf32> to vector<24x8xbf16>
    %148 = vector.extract_strided_slice %86 {offsets = [16, 0], sizes = [8, 32], strides = [1, 1]} : vector<32x32xbf16> to vector<8x32xbf16>
    %cst_52 = arith.constant dense<0.000000e+00> : vector<24x32xf32>
    %149 = tpu.matmul %147, %148, %cst_52 {dimension_numbers = #tpu.dot_dimension_numbers<[1], [0], [0], [1], [0, 0, 1, 1], [], []>} : vector<24x8xbf16>, vector<8x32xbf16>, vector<24x32xf32> -> vector<24x32xf32>
    %150 = arith.addf %129, %149 : vector<24x32xf32>
    %151 = vector.extract_strided_slice %80 {offsets = [0, 24], sizes = [24, 8], strides = [1, 1]} : vector<24x32xbf16> to vector<24x8xbf16>
    %152 = vector.extract_strided_slice %82 {offsets = [0, 24], sizes = [24, 8], strides = [1, 1]} : vector<24x32xbf16> to vector<24x8xbf16>
    %153 = vector.extract_strided_slice %84 {offsets = [0, 24], sizes = [24, 8], strides = [1, 1]} : vector<24x32xbf16> to vector<24x8xbf16>
    %cst_53 = arith.constant dense<0.000000e+00> : vector<24x24xf32>
    %154 = tpu.matmul %151, %152, %cst_53 {dimension_numbers = #tpu.dot_dimension_numbers<[1], [1], [0], [0], [0, 0, 1, 0], [], []>} : vector<24x8xbf16>, vector<24x8xbf16>, vector<24x24xf32> -> vector<24x24xf32>
    %155 = arith.addf %154, %37 : vector<24x24xf32>
    %cst_54 = arith.constant dense<0xFF800000> : vector<24xf32>
    %156 = vector.multi_reduction <maximumf>, %155, %cst_54 [1] : vector<24x24xf32> to vector<24xf32>
    %157 = vector.shape_cast %156 : vector<24xf32> to vector<24x1xf32>
    %158 = vector.broadcast %157 : vector<24x1xf32> to vector<24x24xf32>
    %159 = arith.subf %155, %158 : vector<24x24xf32>
    %160 = math.exp %159 : vector<24x24xf32>
    %cst_55 = arith.constant dense<0.000000e+00> : vector<24xf32>
    %161 = vector.multi_reduction <add>, %160, %cst_55 [1] : vector<24x24xf32> to vector<24xf32>
    %162 = vector.shape_cast %161 : vector<24xf32> to vector<24x1xf32>
    %163 = tpu.reciprocal %162 {approx = true} : vector<24x1xf32> -> vector<24x1xf32>
    %164 = vector.broadcast %163 : vector<24x1xf32> to vector<24x24xf32>
    %165 = arith.mulf %160, %164 : vector<24x24xf32>
    %166 = arith.truncf %165 : vector<24x24xf32> to vector<24x24xbf16>
    %cst_56 = arith.constant dense<0.000000e+00> : vector<24x8xf32>
    %167 = tpu.matmul %166, %153, %cst_56 {dimension_numbers = #tpu.dot_dimension_numbers<[1], [0], [0], [1], [0, 0, 1, 1], [], []>} : vector<24x24xbf16>, vector<24x8xbf16>, vector<24x8xf32> -> vector<24x8xf32>
    %168 = arith.truncf %167 : vector<24x8xf32> to vector<24x8xbf16>
    %169 = vector.extract_strided_slice %86 {offsets = [24, 0], sizes = [8, 32], strides = [1, 1]} : vector<32x32xbf16> to vector<8x32xbf16>
    %cst_57 = arith.constant dense<0.000000e+00> : vector<24x32xf32>
    %170 = tpu.matmul %168, %169, %cst_57 {dimension_numbers = #tpu.dot_dimension_numbers<[1], [0], [0], [1], [0, 0, 1, 1], [], []>} : vector<24x8xbf16>, vector<8x32xbf16>, vector<24x32xf32> -> vector<24x32xf32>
    %171 = arith.addf %150, %170 : vector<24x32xf32>
    %172 = arith.addf %60, %171 : vector<24x32xf32>
    %173 = vector.broadcast %64 : vector<1x32xf32> to vector<24x32xf32>
    %174 = arith.addf %172, %173 : vector<24x32xf32>
    %cst_58 = arith.constant dense<0.000000e+00> : vector<24xf32>
    %175 = vector.multi_reduction <add>, %174, %cst_58 [1] : vector<24x32xf32> to vector<24xf32>
    %176 = vector.shape_cast %175 : vector<24xf32> to vector<24x1xf32>
    %cst_59 = arith.constant 3.200000e+01 : f32
    %177 = vector.broadcast %cst_59 : f32 to vector<24x1xf32>
    %178 = arith.divf %176, %177 : vector<24x1xf32>
    %179 = vector.broadcast %178 : vector<24x1xf32> to vector<24x32xf32>
    %180 = arith.subf %174, %179 : vector<24x32xf32>
    %181 = arith.mulf %180, %180 : vector<24x32xf32>
    %cst_60 = arith.constant dense<0.000000e+00> : vector<24xf32>
    %182 = vector.multi_reduction <add>, %181, %cst_60 [1] : vector<24x32xf32> to vector<24xf32>
    %183 = vector.shape_cast %182 : vector<24xf32> to vector<24x1xf32>
    %cst_61 = arith.constant 3.200000e+01 : f32
    %184 = vector.broadcast %cst_61 : f32 to vector<24x1xf32>
    %185 = arith.divf %183, %184 : vector<24x1xf32>
    %186 = vector.broadcast %178 : vector<24x1xf32> to vector<24x32xf32>
    %187 = arith.subf %174, %186 : vector<24x32xf32>
    %cst_62 = arith.constant 9.99999974E-6 : f32
    %188 = vector.broadcast %cst_62 : f32 to vector<24x1xf32>
    %189 = arith.addf %185, %188 : vector<24x1xf32>
    %190 = math.rsqrt %189 : vector<24x1xf32>
    %191 = vector.broadcast %190 : vector<24x1xf32> to vector<24x32xf32>
    %192 = arith.mulf %187, %191 : vector<24x32xf32>
    %193 = vector.broadcast %67 : vector<1x32xf32> to vector<24x32xf32>
    %194 = arith.mulf %192, %193 : vector<24x32xf32>
    %195 = vector.broadcast %68 : vector<1x32xf32> to vector<24x32xf32>
    %196 = arith.addf %194, %195 : vector<24x32xf32>
    %197 = arith.truncf %196 : vector<24x32xf32> to vector<24x32xbf16>
    %c0_63 = arith.constant 0 : index
    %c0_64 = arith.constant 0 : index
    %c0_65 = arith.constant 0 : index
    %198 = vector.load %arg10[%c0_63, %c0_64, %c0_65] : memref<2x32x128xbf16, #tpu.memory_space<vmem>>, vector<1x32x128xbf16>
    %199 = vector.shape_cast %198 : vector<1x32x128xbf16> to vector<32x128xbf16>
    %cst_66 = arith.constant dense<0.000000e+00> : vector<24x128xf32>
    %200 = tpu.matmul %197, %199, %cst_66 {dimension_numbers = #tpu.dot_dimension_numbers<[1], [0], [0], [1], [0, 0, 1, 1], [], []>} : vector<24x32xbf16>, vector<32x128xbf16>, vector<24x128xf32> -> vector<24x128xf32>
    %201 = vector.broadcast %65 : vector<1x128xf32> to vector<24x128xf32>
    %202 = arith.addf %200, %201 : vector<24x128xf32>
    %cst_67 = arith.constant 0.000000e+00 : f32
    %203 = vector.broadcast %cst_67 : f32 to vector<24x128xf32>
    %204 = arith.maximumf %202, %203 : vector<24x128xf32>
    %205 = arith.truncf %204 : vector<24x128xf32> to vector<24x128xbf16>
    %c0_68 = arith.constant 0 : index
    %c0_69 = arith.constant 0 : index
    %c0_70 = arith.constant 0 : index
    %206 = vector.load %arg11[%c0_68, %c0_69, %c0_70] : memref<2x128x32xbf16, #tpu.memory_space<vmem>>, vector<1x128x32xbf16>
    %207 = vector.shape_cast %206 : vector<1x128x32xbf16> to vector<128x32xbf16>
    %cst_71 = arith.constant dense<0.000000e+00> : vector<24x32xf32>
    %208 = tpu.matmul %205, %207, %cst_71 {dimension_numbers = #tpu.dot_dimension_numbers<[1], [0], [0], [1], [0, 0, 1, 1], [], []>} : vector<24x128xbf16>, vector<128x32xbf16>, vector<24x32xf32> -> vector<24x32xf32>
    %209 = vector.broadcast %66 : vector<1x32xf32> to vector<24x32xf32>
    %210 = arith.addf %208, %209 : vector<24x32xf32>
    %211 = arith.addf %196, %210 : vector<24x32xf32>
    %cst_72 = arith.constant dense<0.000000e+00> : vector<24xf32>
    %212 = vector.multi_reduction <add>, %211, %cst_72 [1] : vector<24x32xf32> to vector<24xf32>
    %213 = vector.shape_cast %212 : vector<24xf32> to vector<24x1xf32>
    %cst_73 = arith.constant 3.200000e+01 : f32
    %214 = vector.broadcast %cst_73 : f32 to vector<24x1xf32>
    %215 = arith.divf %213, %214 : vector<24x1xf32>
    %216 = vector.broadcast %215 : vector<24x1xf32> to vector<24x32xf32>
    %217 = arith.subf %211, %216 : vector<24x32xf32>
    %218 = arith.mulf %217, %217 : vector<24x32xf32>
    %cst_74 = arith.constant dense<0.000000e+00> : vector<24xf32>
    %219 = vector.multi_reduction <add>, %218, %cst_74 [1] : vector<24x32xf32> to vector<24xf32>
    %220 = vector.shape_cast %219 : vector<24xf32> to vector<24x1xf32>
    %cst_75 = arith.constant 3.200000e+01 : f32
    %221 = vector.broadcast %cst_75 : f32 to vector<24x1xf32>
    %222 = arith.divf %220, %221 : vector<24x1xf32>
    %223 = vector.broadcast %215 : vector<24x1xf32> to vector<24x32xf32>
    %224 = arith.subf %211, %223 : vector<24x32xf32>
    %cst_76 = arith.constant 9.99999974E-6 : f32
    %225 = vector.broadcast %cst_76 : f32 to vector<24x1xf32>
    %226 = arith.addf %222, %225 : vector<24x1xf32>
    %227 = math.rsqrt %226 : vector<24x1xf32>
    %228 = vector.broadcast %227 : vector<24x1xf32> to vector<24x32xf32>
    %229 = arith.mulf %224, %228 : vector<24x32xf32>
    %230 = vector.broadcast %69 : vector<1x32xf32> to vector<24x32xf32>
    %231 = arith.mulf %229, %230 : vector<24x32xf32>
    %232 = vector.broadcast %70 : vector<1x32xf32> to vector<24x32xf32>
    %233 = arith.addf %231, %232 : vector<24x32xf32>
    %c1 = arith.constant 1 : index
    %c0_77 = arith.constant 0 : index
    %c0_78 = arith.constant 0 : index
    %234 = vector.load %arg12[%c1, %c0_77, %c0_78] : memref<2x8x128xf32, #tpu.memory_space<vmem>>, vector<1x8x128xf32>
    %235 = vector.shape_cast %234 : vector<1x8x128xf32> to vector<8x128xf32>
    %236 = vector.extract_strided_slice %235 {offsets = [0, 0], sizes = [1, 96], strides = [1, 1]} : vector<8x128xf32> to vector<1x96xf32>
    %237 = vector.extract_strided_slice %235 {offsets = [1, 0], sizes = [1, 32], strides = [1, 1]} : vector<8x128xf32> to vector<1x32xf32>
    %238 = vector.extract_strided_slice %235 {offsets = [2, 0], sizes = [1, 128], strides = [1, 1]} : vector<8x128xf32> to vector<1x128xf32>
    %239 = vector.extract_strided_slice %235 {offsets = [3, 0], sizes = [1, 32], strides = [1, 1]} : vector<8x128xf32> to vector<1x32xf32>
    %240 = vector.extract_strided_slice %235 {offsets = [4, 0], sizes = [1, 32], strides = [1, 1]} : vector<8x128xf32> to vector<1x32xf32>
    %241 = vector.extract_strided_slice %235 {offsets = [5, 0], sizes = [1, 32], strides = [1, 1]} : vector<8x128xf32> to vector<1x32xf32>
    %242 = vector.extract_strided_slice %235 {offsets = [6, 0], sizes = [1, 32], strides = [1, 1]} : vector<8x128xf32> to vector<1x32xf32>
    %243 = vector.extract_strided_slice %235 {offsets = [7, 0], sizes = [1, 32], strides = [1, 1]} : vector<8x128xf32> to vector<1x32xf32>
    %244 = arith.truncf %233 : vector<24x32xf32> to vector<24x32xbf16>
    %c1_79 = arith.constant 1 : index
    %c0_80 = arith.constant 0 : index
    %c0_81 = arith.constant 0 : index
    %245 = vector.load %arg8[%c1_79, %c0_80, %c0_81] : memref<2x32x96xbf16, #tpu.memory_space<vmem>>, vector<1x32x96xbf16>
    %246 = vector.shape_cast %245 : vector<1x32x96xbf16> to vector<32x96xbf16>
    %cst_82 = arith.constant dense<0.000000e+00> : vector<24x96xf32>
    %247 = tpu.matmul %244, %246, %cst_82 {dimension_numbers = #tpu.dot_dimension_numbers<[1], [0], [0], [1], [0, 0, 1, 1], [], []>} : vector<24x32xbf16>, vector<32x96xbf16>, vector<24x96xf32> -> vector<24x96xf32>
    %248 = vector.broadcast %236 : vector<1x96xf32> to vector<24x96xf32>
    %249 = arith.addf %247, %248 : vector<24x96xf32>
    %250 = vector.extract_strided_slice %249 {offsets = [0, 0], sizes = [24, 32], strides = [1, 1]} : vector<24x96xf32> to vector<24x32xf32>
    %cst_83 = arith.constant 0.353553385 : f32
    %251 = vector.broadcast %cst_83 : f32 to vector<24x32xf32>
    %252 = arith.mulf %250, %251 : vector<24x32xf32>
    %253 = arith.truncf %252 : vector<24x32xf32> to vector<24x32xbf16>
    %254 = vector.extract_strided_slice %249 {offsets = [0, 32], sizes = [24, 32], strides = [1, 1]} : vector<24x96xf32> to vector<24x32xf32>
    %255 = arith.truncf %254 : vector<24x32xf32> to vector<24x32xbf16>
    %256 = vector.extract_strided_slice %249 {offsets = [0, 64], sizes = [24, 32], strides = [1, 1]} : vector<24x96xf32> to vector<24x32xf32>
    %257 = arith.truncf %256 : vector<24x32xf32> to vector<24x32xbf16>
    %c1_84 = arith.constant 1 : index
    %c0_85 = arith.constant 0 : index
    %c0_86 = arith.constant 0 : index
    %258 = vector.load %arg9[%c1_84, %c0_85, %c0_86] : memref<2x32x32xbf16, #tpu.memory_space<vmem>>, vector<1x32x32xbf16>
    %259 = vector.shape_cast %258 : vector<1x32x32xbf16> to vector<32x32xbf16>
    %cst_87 = arith.constant 0.000000e+00 : f32
    %260 = vector.broadcast %cst_87 : f32 to vector<24x32xf32>
    %261 = vector.extract_strided_slice %253 {offsets = [0, 0], sizes = [24, 8], strides = [1, 1]} : vector<24x32xbf16> to vector<24x8xbf16>
    %262 = vector.extract_strided_slice %255 {offsets = [0, 0], sizes = [24, 8], strides = [1, 1]} : vector<24x32xbf16> to vector<24x8xbf16>
    %263 = vector.extract_strided_slice %257 {offsets = [0, 0], sizes = [24, 8], strides = [1, 1]} : vector<24x32xbf16> to vector<24x8xbf16>
    %cst_88 = arith.constant dense<0.000000e+00> : vector<24x24xf32>
    %264 = tpu.matmul %261, %262, %cst_88 {dimension_numbers = #tpu.dot_dimension_numbers<[1], [1], [0], [0], [0, 0, 1, 0], [], []>} : vector<24x8xbf16>, vector<24x8xbf16>, vector<24x24xf32> -> vector<24x24xf32>
    %265 = arith.addf %264, %37 : vector<24x24xf32>
    %cst_89 = arith.constant dense<0xFF800000> : vector<24xf32>
    %266 = vector.multi_reduction <maximumf>, %265, %cst_89 [1] : vector<24x24xf32> to vector<24xf32>
    %267 = vector.shape_cast %266 : vector<24xf32> to vector<24x1xf32>
    %268 = vector.broadcast %267 : vector<24x1xf32> to vector<24x24xf32>
    %269 = arith.subf %265, %268 : vector<24x24xf32>
    %270 = math.exp %269 : vector<24x24xf32>
    %cst_90 = arith.constant dense<0.000000e+00> : vector<24xf32>
    %271 = vector.multi_reduction <add>, %270, %cst_90 [1] : vector<24x24xf32> to vector<24xf32>
    %272 = vector.shape_cast %271 : vector<24xf32> to vector<24x1xf32>
    %273 = tpu.reciprocal %272 {approx = true} : vector<24x1xf32> -> vector<24x1xf32>
    %274 = vector.broadcast %273 : vector<24x1xf32> to vector<24x24xf32>
    %275 = arith.mulf %270, %274 : vector<24x24xf32>
    %276 = arith.truncf %275 : vector<24x24xf32> to vector<24x24xbf16>
    %cst_91 = arith.constant dense<0.000000e+00> : vector<24x8xf32>
    %277 = tpu.matmul %276, %263, %cst_91 {dimension_numbers = #tpu.dot_dimension_numbers<[1], [0], [0], [1], [0, 0, 1, 1], [], []>} : vector<24x24xbf16>, vector<24x8xbf16>, vector<24x8xf32> -> vector<24x8xf32>
    %278 = arith.truncf %277 : vector<24x8xf32> to vector<24x8xbf16>
    %279 = vector.extract_strided_slice %259 {offsets = [0, 0], sizes = [8, 32], strides = [1, 1]} : vector<32x32xbf16> to vector<8x32xbf16>
    %cst_92 = arith.constant dense<0.000000e+00> : vector<24x32xf32>
    %280 = tpu.matmul %278, %279, %cst_92 {dimension_numbers = #tpu.dot_dimension_numbers<[1], [0], [0], [1], [0, 0, 1, 1], [], []>} : vector<24x8xbf16>, vector<8x32xbf16>, vector<24x32xf32> -> vector<24x32xf32>
    %281 = arith.addf %260, %280 : vector<24x32xf32>
    %282 = vector.extract_strided_slice %253 {offsets = [0, 8], sizes = [24, 8], strides = [1, 1]} : vector<24x32xbf16> to vector<24x8xbf16>
    %283 = vector.extract_strided_slice %255 {offsets = [0, 8], sizes = [24, 8], strides = [1, 1]} : vector<24x32xbf16> to vector<24x8xbf16>
    %284 = vector.extract_strided_slice %257 {offsets = [0, 8], sizes = [24, 8], strides = [1, 1]} : vector<24x32xbf16> to vector<24x8xbf16>
    %cst_93 = arith.constant dense<0.000000e+00> : vector<24x24xf32>
    %285 = tpu.matmul %282, %283, %cst_93 {dimension_numbers = #tpu.dot_dimension_numbers<[1], [1], [0], [0], [0, 0, 1, 0], [], []>} : vector<24x8xbf16>, vector<24x8xbf16>, vector<24x24xf32> -> vector<24x24xf32>
    %286 = arith.addf %285, %37 : vector<24x24xf32>
    %cst_94 = arith.constant dense<0xFF800000> : vector<24xf32>
    %287 = vector.multi_reduction <maximumf>, %286, %cst_94 [1] : vector<24x24xf32> to vector<24xf32>
    %288 = vector.shape_cast %287 : vector<24xf32> to vector<24x1xf32>
    %289 = vector.broadcast %288 : vector<24x1xf32> to vector<24x24xf32>
    %290 = arith.subf %286, %289 : vector<24x24xf32>
    %291 = math.exp %290 : vector<24x24xf32>
    %cst_95 = arith.constant dense<0.000000e+00> : vector<24xf32>
    %292 = vector.multi_reduction <add>, %291, %cst_95 [1] : vector<24x24xf32> to vector<24xf32>
    %293 = vector.shape_cast %292 : vector<24xf32> to vector<24x1xf32>
    %294 = tpu.reciprocal %293 {approx = true} : vector<24x1xf32> -> vector<24x1xf32>
    %295 = vector.broadcast %294 : vector<24x1xf32> to vector<24x24xf32>
    %296 = arith.mulf %291, %295 : vector<24x24xf32>
    %297 = arith.truncf %296 : vector<24x24xf32> to vector<24x24xbf16>
    %cst_96 = arith.constant dense<0.000000e+00> : vector<24x8xf32>
    %298 = tpu.matmul %297, %284, %cst_96 {dimension_numbers = #tpu.dot_dimension_numbers<[1], [0], [0], [1], [0, 0, 1, 1], [], []>} : vector<24x24xbf16>, vector<24x8xbf16>, vector<24x8xf32> -> vector<24x8xf32>
    %299 = arith.truncf %298 : vector<24x8xf32> to vector<24x8xbf16>
    %300 = vector.extract_strided_slice %259 {offsets = [8, 0], sizes = [8, 32], strides = [1, 1]} : vector<32x32xbf16> to vector<8x32xbf16>
    %cst_97 = arith.constant dense<0.000000e+00> : vector<24x32xf32>
    %301 = tpu.matmul %299, %300, %cst_97 {dimension_numbers = #tpu.dot_dimension_numbers<[1], [0], [0], [1], [0, 0, 1, 1], [], []>} : vector<24x8xbf16>, vector<8x32xbf16>, vector<24x32xf32> -> vector<24x32xf32>
    %302 = arith.addf %281, %301 : vector<24x32xf32>
    %303 = vector.extract_strided_slice %253 {offsets = [0, 16], sizes = [24, 8], strides = [1, 1]} : vector<24x32xbf16> to vector<24x8xbf16>
    %304 = vector.extract_strided_slice %255 {offsets = [0, 16], sizes = [24, 8], strides = [1, 1]} : vector<24x32xbf16> to vector<24x8xbf16>
    %305 = vector.extract_strided_slice %257 {offsets = [0, 16], sizes = [24, 8], strides = [1, 1]} : vector<24x32xbf16> to vector<24x8xbf16>
    %cst_98 = arith.constant dense<0.000000e+00> : vector<24x24xf32>
    %306 = tpu.matmul %303, %304, %cst_98 {dimension_numbers = #tpu.dot_dimension_numbers<[1], [1], [0], [0], [0, 0, 1, 0], [], []>} : vector<24x8xbf16>, vector<24x8xbf16>, vector<24x24xf32> -> vector<24x24xf32>
    %307 = arith.addf %306, %37 : vector<24x24xf32>
    %cst_99 = arith.constant dense<0xFF800000> : vector<24xf32>
    %308 = vector.multi_reduction <maximumf>, %307, %cst_99 [1] : vector<24x24xf32> to vector<24xf32>
    %309 = vector.shape_cast %308 : vector<24xf32> to vector<24x1xf32>
    %310 = vector.broadcast %309 : vector<24x1xf32> to vector<24x24xf32>
    %311 = arith.subf %307, %310 : vector<24x24xf32>
    %312 = math.exp %311 : vector<24x24xf32>
    %cst_100 = arith.constant dense<0.000000e+00> : vector<24xf32>
    %313 = vector.multi_reduction <add>, %312, %cst_100 [1] : vector<24x24xf32> to vector<24xf32>
    %314 = vector.shape_cast %313 : vector<24xf32> to vector<24x1xf32>
    %315 = tpu.reciprocal %314 {approx = true} : vector<24x1xf32> -> vector<24x1xf32>
    %316 = vector.broadcast %315 : vector<24x1xf32> to vector<24x24xf32>
    %317 = arith.mulf %312, %316 : vector<24x24xf32>
    %318 = arith.truncf %317 : vector<24x24xf32> to vector<24x24xbf16>
    %cst_101 = arith.constant dense<0.000000e+00> : vector<24x8xf32>
    %319 = tpu.matmul %318, %305, %cst_101 {dimension_numbers = #tpu.dot_dimension_numbers<[1], [0], [0], [1], [0, 0, 1, 1], [], []>} : vector<24x24xbf16>, vector<24x8xbf16>, vector<24x8xf32> -> vector<24x8xf32>
    %320 = arith.truncf %319 : vector<24x8xf32> to vector<24x8xbf16>
    %321 = vector.extract_strided_slice %259 {offsets = [16, 0], sizes = [8, 32], strides = [1, 1]} : vector<32x32xbf16> to vector<8x32xbf16>
    %cst_102 = arith.constant dense<0.000000e+00> : vector<24x32xf32>
    %322 = tpu.matmul %320, %321, %cst_102 {dimension_numbers = #tpu.dot_dimension_numbers<[1], [0], [0], [1], [0, 0, 1, 1], [], []>} : vector<24x8xbf16>, vector<8x32xbf16>, vector<24x32xf32> -> vector<24x32xf32>
    %323 = arith.addf %302, %322 : vector<24x32xf32>
    %324 = vector.extract_strided_slice %253 {offsets = [0, 24], sizes = [24, 8], strides = [1, 1]} : vector<24x32xbf16> to vector<24x8xbf16>
    %325 = vector.extract_strided_slice %255 {offsets = [0, 24], sizes = [24, 8], strides = [1, 1]} : vector<24x32xbf16> to vector<24x8xbf16>
    %326 = vector.extract_strided_slice %257 {offsets = [0, 24], sizes = [24, 8], strides = [1, 1]} : vector<24x32xbf16> to vector<24x8xbf16>
    %cst_103 = arith.constant dense<0.000000e+00> : vector<24x24xf32>
    %327 = tpu.matmul %324, %325, %cst_103 {dimension_numbers = #tpu.dot_dimension_numbers<[1], [1], [0], [0], [0, 0, 1, 0], [], []>} : vector<24x8xbf16>, vector<24x8xbf16>, vector<24x24xf32> -> vector<24x24xf32>
    %328 = arith.addf %327, %37 : vector<24x24xf32>
    %cst_104 = arith.constant dense<0xFF800000> : vector<24xf32>
    %329 = vector.multi_reduction <maximumf>, %328, %cst_104 [1] : vector<24x24xf32> to vector<24xf32>
    %330 = vector.shape_cast %329 : vector<24xf32> to vector<24x1xf32>
    %331 = vector.broadcast %330 : vector<24x1xf32> to vector<24x24xf32>
    %332 = arith.subf %328, %331 : vector<24x24xf32>
    %333 = math.exp %332 : vector<24x24xf32>
    %cst_105 = arith.constant dense<0.000000e+00> : vector<24xf32>
    %334 = vector.multi_reduction <add>, %333, %cst_105 [1] : vector<24x24xf32> to vector<24xf32>
    %335 = vector.shape_cast %334 : vector<24xf32> to vector<24x1xf32>
    %336 = tpu.reciprocal %335 {approx = true} : vector<24x1xf32> -> vector<24x1xf32>
    %337 = vector.broadcast %336 : vector<24x1xf32> to vector<24x24xf32>
    %338 = arith.mulf %333, %337 : vector<24x24xf32>
    %339 = arith.truncf %338 : vector<24x24xf32> to vector<24x24xbf16>
    %cst_106 = arith.constant dense<0.000000e+00> : vector<24x8xf32>
    %340 = tpu.matmul %339, %326, %cst_106 {dimension_numbers = #tpu.dot_dimension_numbers<[1], [0], [0], [1], [0, 0, 1, 1], [], []>} : vector<24x24xbf16>, vector<24x8xbf16>, vector<24x8xf32> -> vector<24x8xf32>
    %341 = arith.truncf %340 : vector<24x8xf32> to vector<24x8xbf16>
    %342 = vector.extract_strided_slice %259 {offsets = [24, 0], sizes = [8, 32], strides = [1, 1]} : vector<32x32xbf16> to vector<8x32xbf16>
    %cst_107 = arith.constant dense<0.000000e+00> : vector<24x32xf32>
    %343 = tpu.matmul %341, %342, %cst_107 {dimension_numbers = #tpu.dot_dimension_numbers<[1], [0], [0], [1], [0, 0, 1, 1], [], []>} : vector<24x8xbf16>, vector<8x32xbf16>, vector<24x32xf32> -> vector<24x32xf32>
    %344 = arith.addf %323, %343 : vector<24x32xf32>
    %345 = arith.addf %233, %344 : vector<24x32xf32>
    %346 = vector.broadcast %237 : vector<1x32xf32> to vector<24x32xf32>
    %347 = arith.addf %345, %346 : vector<24x32xf32>
    %cst_108 = arith.constant dense<0.000000e+00> : vector<24xf32>
    %348 = vector.multi_reduction <add>, %347, %cst_108 [1] : vector<24x32xf32> to vector<24xf32>
    %349 = vector.shape_cast %348 : vector<24xf32> to vector<24x1xf32>
    %cst_109 = arith.constant 3.200000e+01 : f32
    %350 = vector.broadcast %cst_109 : f32 to vector<24x1xf32>
    %351 = arith.divf %349, %350 : vector<24x1xf32>
    %352 = vector.broadcast %351 : vector<24x1xf32> to vector<24x32xf32>
    %353 = arith.subf %347, %352 : vector<24x32xf32>
    %354 = arith.mulf %353, %353 : vector<24x32xf32>
    %cst_110 = arith.constant dense<0.000000e+00> : vector<24xf32>
    %355 = vector.multi_reduction <add>, %354, %cst_110 [1] : vector<24x32xf32> to vector<24xf32>
    %356 = vector.shape_cast %355 : vector<24xf32> to vector<24x1xf32>
    %cst_111 = arith.constant 3.200000e+01 : f32
    %357 = vector.broadcast %cst_111 : f32 to vector<24x1xf32>
    %358 = arith.divf %356, %357 : vector<24x1xf32>
    %359 = vector.broadcast %351 : vector<24x1xf32> to vector<24x32xf32>
    %360 = arith.subf %347, %359 : vector<24x32xf32>
    %cst_112 = arith.constant 9.99999974E-6 : f32
    %361 = vector.broadcast %cst_112 : f32 to vector<24x1xf32>
    %362 = arith.addf %358, %361 : vector<24x1xf32>
    %363 = math.rsqrt %362 : vector<24x1xf32>
    %364 = vector.broadcast %363 : vector<24x1xf32> to vector<24x32xf32>
    %365 = arith.mulf %360, %364 : vector<24x32xf32>
    %366 = vector.broadcast %240 : vector<1x32xf32> to vector<24x32xf32>
    %367 = arith.mulf %365, %366 : vector<24x32xf32>
    %368 = vector.broadcast %241 : vector<1x32xf32> to vector<24x32xf32>
    %369 = arith.addf %367, %368 : vector<24x32xf32>
    %370 = arith.truncf %369 : vector<24x32xf32> to vector<24x32xbf16>
    %c1_113 = arith.constant 1 : index
    %c0_114 = arith.constant 0 : index
    %c0_115 = arith.constant 0 : index
    %371 = vector.load %arg10[%c1_113, %c0_114, %c0_115] : memref<2x32x128xbf16, #tpu.memory_space<vmem>>, vector<1x32x128xbf16>
    %372 = vector.shape_cast %371 : vector<1x32x128xbf16> to vector<32x128xbf16>
    %cst_116 = arith.constant dense<0.000000e+00> : vector<24x128xf32>
    %373 = tpu.matmul %370, %372, %cst_116 {dimension_numbers = #tpu.dot_dimension_numbers<[1], [0], [0], [1], [0, 0, 1, 1], [], []>} : vector<24x32xbf16>, vector<32x128xbf16>, vector<24x128xf32> -> vector<24x128xf32>
    %374 = vector.broadcast %238 : vector<1x128xf32> to vector<24x128xf32>
    %375 = arith.addf %373, %374 : vector<24x128xf32>
    %cst_117 = arith.constant 0.000000e+00 : f32
    %376 = vector.broadcast %cst_117 : f32 to vector<24x128xf32>
    %377 = arith.maximumf %375, %376 : vector<24x128xf32>
    %378 = arith.truncf %377 : vector<24x128xf32> to vector<24x128xbf16>
    %c1_118 = arith.constant 1 : index
    %c0_119 = arith.constant 0 : index
    %c0_120 = arith.constant 0 : index
    %379 = vector.load %arg11[%c1_118, %c0_119, %c0_120] : memref<2x128x32xbf16, #tpu.memory_space<vmem>>, vector<1x128x32xbf16>
    %380 = vector.shape_cast %379 : vector<1x128x32xbf16> to vector<128x32xbf16>
    %cst_121 = arith.constant dense<0.000000e+00> : vector<24x32xf32>
    %381 = tpu.matmul %378, %380, %cst_121 {dimension_numbers = #tpu.dot_dimension_numbers<[1], [0], [0], [1], [0, 0, 1, 1], [], []>} : vector<24x128xbf16>, vector<128x32xbf16>, vector<24x32xf32> -> vector<24x32xf32>
    %382 = vector.broadcast %239 : vector<1x32xf32> to vector<24x32xf32>
    %383 = arith.addf %381, %382 : vector<24x32xf32>
    %384 = arith.addf %369, %383 : vector<24x32xf32>
    %cst_122 = arith.constant dense<0.000000e+00> : vector<24xf32>
    %385 = vector.multi_reduction <add>, %384, %cst_122 [1] : vector<24x32xf32> to vector<24xf32>
    %386 = vector.shape_cast %385 : vector<24xf32> to vector<24x1xf32>
    %cst_123 = arith.constant 3.200000e+01 : f32
    %387 = vector.broadcast %cst_123 : f32 to vector<24x1xf32>
    %388 = arith.divf %386, %387 : vector<24x1xf32>
    %389 = vector.broadcast %388 : vector<24x1xf32> to vector<24x32xf32>
    %390 = arith.subf %384, %389 : vector<24x32xf32>
    %391 = arith.mulf %390, %390 : vector<24x32xf32>
    %cst_124 = arith.constant dense<0.000000e+00> : vector<24xf32>
    %392 = vector.multi_reduction <add>, %391, %cst_124 [1] : vector<24x32xf32> to vector<24xf32>
    %393 = vector.shape_cast %392 : vector<24xf32> to vector<24x1xf32>
    %cst_125 = arith.constant 3.200000e+01 : f32
    %394 = vector.broadcast %cst_125 : f32 to vector<24x1xf32>
    %395 = arith.divf %393, %394 : vector<24x1xf32>
    %396 = vector.broadcast %388 : vector<24x1xf32> to vector<24x32xf32>
    %397 = arith.subf %384, %396 : vector<24x32xf32>
    %cst_126 = arith.constant 9.99999974E-6 : f32
    %398 = vector.broadcast %cst_126 : f32 to vector<24x1xf32>
    %399 = arith.addf %395, %398 : vector<24x1xf32>
    %400 = math.rsqrt %399 : vector<24x1xf32>
    %401 = vector.broadcast %400 : vector<24x1xf32> to vector<24x32xf32>
    %402 = arith.mulf %397, %401 : vector<24x32xf32>
    %403 = vector.broadcast %242 : vector<1x32xf32> to vector<24x32xf32>
    %404 = arith.mulf %402, %403 : vector<24x32xf32>
    %405 = vector.broadcast %243 : vector<1x32xf32> to vector<24x32xf32>
    %406 = arith.addf %404, %405 : vector<24x32xf32>
    %407 = vector.shape_cast %406 : vector<24x32xf32> to vector<3x8x32xf32>
    %c0_127 = arith.constant 0 : index
    %c0_128 = arith.constant 0 : index
    %c0_129 = arith.constant 0 : index
    %408 = vector.load %arg13[%c0_127, %c0_128, %c0_129] : memref<3x8x32xf32, #tpu.memory_space<vmem>>, vector<3x8x32xf32>
    tpu.vector_store %arg13[%c0_127, %c0_128, %c0_129], %407 {strides = array<i32>} : memref<3x8x32xf32, #tpu.memory_space<vmem>>, vector<3x8x32xf32>,
    return
  }
  func.func @transform_0(%arg0: i32) -> (i32, i32) {
    %c0_i32 = arith.constant 0 : i32
    %c0_i32_0 = arith.constant 0 : i32
    return %arg0, %c0_i32 : i32, i32
  }
  func.func @transform_1(%arg0: i32) -> (i32, i32) {
    %c0_i32 = arith.constant 0 : i32
    %c0_i32_0 = arith.constant 0 : i32
    return %arg0, %c0_i32 : i32, i32
  }
  func.func @transform_2(%arg0: i32) -> (i32, i32) {
    %c0_i32 = arith.constant 0 : i32
    %c0_i32_0 = arith.constant 0 : i32
    return %arg0, %c0_i32 : i32, i32
  }
  func.func @transform_3(%arg0: i32) -> (i32, i32) {
    %c0_i32 = arith.constant 0 : i32
    %c0_i32_0 = arith.constant 0 : i32
    %c0_i32_1 = arith.constant 0 : i32
    return %c0_i32, %c0_i32_0 : i32, i32
  }
  func.func @transform_4(%arg0: i32) -> (i32, i32) {
    %c0_i32 = arith.constant 0 : i32
    %c0_i32_0 = arith.constant 0 : i32
    %c0_i32_1 = arith.constant 0 : i32
    return %c0_i32, %c0_i32_0 : i32, i32
  }
  func.func @transform_5(%arg0: i32) -> (i32, i32) {
    %c0_i32 = arith.constant 0 : i32
    %c0_i32_0 = arith.constant 0 : i32
    %c0_i32_1 = arith.constant 0 : i32
    return %c0_i32, %c0_i32_0 : i32, i32
  }
  func.func @transform_6(%arg0: i32) -> (i32, i32) {
    %c0_i32 = arith.constant 0 : i32
    %c0_i32_0 = arith.constant 0 : i32
    %c0_i32_1 = arith.constant 0 : i32
    return %c0_i32, %c0_i32_0 : i32, i32
  }
  func.func @transform_7(%arg0: i32) -> (i32, i32, i32) {
    %c0_i32 = arith.constant 0 : i32
    %c0_i32_0 = arith.constant 0 : i32
    %c0_i32_1 = arith.constant 0 : i32
    %c0_i32_2 = arith.constant 0 : i32
    return %c0_i32, %c0_i32_0, %c0_i32_1 : i32, i32, i32
  }
  func.func @transform_8(%arg0: i32) -> (i32, i32, i32) {
    %c0_i32 = arith.constant 0 : i32
    %c0_i32_0 = arith.constant 0 : i32
    %c0_i32_1 = arith.constant 0 : i32
    %c0_i32_2 = arith.constant 0 : i32
    return %c0_i32, %c0_i32_0, %c0_i32_1 : i32, i32, i32
  }
  func.func @transform_9(%arg0: i32) -> (i32, i32, i32) {
    %c0_i32 = arith.constant 0 : i32
    %c0_i32_0 = arith.constant 0 : i32
    %c0_i32_1 = arith.constant 0 : i32
    %c0_i32_2 = arith.constant 0 : i32
    return %c0_i32, %c0_i32_0, %c0_i32_1 : i32, i32, i32
  }
  func.func @transform_10(%arg0: i32) -> (i32, i32, i32) {
    %c0_i32 = arith.constant 0 : i32
    %c0_i32_0 = arith.constant 0 : i32
    %c0_i32_1 = arith.constant 0 : i32
    %c0_i32_2 = arith.constant 0 : i32
    return %c0_i32, %c0_i32_0, %c0_i32_1 : i32, i32, i32
  }
  func.func @transform_11(%arg0: i32) -> (i32, i32, i32) {
    %c0_i32 = arith.constant 0 : i32
    %c0_i32_0 = arith.constant 0 : i32
    %c0_i32_1 = arith.constant 0 : i32
    %c0_i32_2 = arith.constant 0 : i32
    return %c0_i32, %c0_i32_0, %c0_i32_1 : i32, i32, i32
  }
  func.func @transform_12(%arg0: i32) -> (i32, i32, i32) {
    %c0_i32 = arith.constant 0 : i32
    %c0_i32_0 = arith.constant 0 : i32
    %c0_i32_1 = arith.constant 0 : i32
    return %c0_i32, %arg0, %c0_i32_0 : i32, i32, i32
  }
}

</mosaic_0001>

<bundles_post_ra>
// kernel: attention_module_forward.1
= control target key start
LH: loop header
LB: loop body
LE: loop exit
PB: predicated region body
PF: predicated region fallthrough
CT: control target
= control target key end

     0   :  { %17 = vsyncpa [#allocation3], 0  ;;  %s4334_s21 = smov 0   ;;  %s4336_s22 = smov 0   ;;  %s4986_s0 = inlined_call_operand.vmem [shape: f32[16,12], index: 0, kind: input, shape index: {}]   ;;  %s4987_s1 = inlined_call_operand.vmem [shape: f32[16,8], index: 1, kind: input, shape index: {}]   ;;  %s4988_s2 = inlined_call_operand.vmem [shape: f32[16,16], index: 2, kind: input, shape index: {}]   ;;  %s4989_s3 = inlined_call_operand.vmem [shape: bf16[12,32], index: 3, kind: input, shape index: {}]   ;;  %s4990_s4 = inlined_call_operand.vmem [shape: bf16[8,32], index: 4, kind: input, shape index: {}]   ;;  %s4991_s5 = inlined_call_operand.vmem [shape: bf16[16,32], index: 5, kind: input, shape index: {}]   ;;  %s4992_s6 = inlined_call_operand.hbm [shape: f32[3,32], index: 6, kind: input, shape index: {}]   ;;  %s4993_s7 = inlined_call_operand.vmem [shape: bf16[2,32,96], index: 7, kind: input, shape index: {}]   ;;  %s4994_s8 = inlined_call_operand.vmem [shape: bf16[2,32,32], index: 8, kind: input, shape index: {}]   ;;  %s4995_s9 = inlined_call_operand.vmem [shape: bf16[2,32,128], index: 9, kind: input, shape index: {}]   ;;  %s4996_s10 = inlined_call_operand.vmem [shape: bf16[2,128,32], index: 10, kind: input, shape index: {}]   ;;  %s4997_s11 = inlined_call_operand.vmem [shape: f32[2,8,128], index: 11, kind: input, shape index: {}]   ;;  %s4998_s12 = inlined_call_operand.vmem [shape: f32[3,16,32], index: 12, kind: output, shape index: {}]  }
   0x1   :  { %s4338_s23 = smov 0  }
   0x2 LB: > { %s4347_s24 = sadd.s32 4294967295, %s4252_s23   ;;  %s4349_s25 = sadd.s32 1, %s4252_s23   ;;  %s4252_s23 = sphi %s4338_s23, %s5024_s23   ;;  %s4248_s22 = sphi %s4336_s22, %s5023_s22   ;;  %s4244_s21 = sphi %s4334_s21, %s5022_s21  }
   0x3   : > { %s294_s26 = ssub.s32 %s4252_s23, %s4349_s25  ;;  %s297_s27 = sadd.s32 1, %s4248_s22 }
   0x4   : > { %p295_p0 = scmp.eq.s32.totalorder %s294_s26, 0  ;;  %p307_p1 = scmp.ne.s32.totalorder %s4248_s22, %s4244_s21 }
   0x5   : > { %p308_p2 = scmp.eq.s32.totalorder %s4347_s24, 1  ;;  %p3449_p3 = scmp.ge.s32.totalorder %s4252_s23, 1 }
   0x6   : > { %s4357_s28 = scalar_select %p295_p0, %s4248_s22, %s297_s27  }
   0x7   : > { %p4359_p4 = por %p308_p2, %p307_p1  ;;  %p321_p5 = scmp.lt.s32.totalorder %s4252_s23, 3 }
   0x8   : > { %p4011_p6 = scmp.eq.s32.totalorder %s4347_s24, 0  ;;  %s4254_s13 = smov [#allocation2]  }
   0x9   : > { %p4364_p7 = pnand %p3449_p3, %p321_p5  ;;  %s343_s14 = sshll.u32 %s4254_s13, 4  ;;  %s344_s14 = int_to_ptr.vmem [resolvable:$true] %s343_s14 }
   0xa   : > { %s4211_s15 = scalar_lea.vmem %s344_s14, 64  ;;  %p4219_p0 = scmp.lt.s32.totalorder %s344_s14, %s344_s14 }
   0xb   : > { %p4007_p8 = pneg %p4364_p7  ;;  %p4212_p11 = scmp.ne.s32.totalorder %s344_s14, %s4211_s15 }
   0xc   : > { %p4220_p1 = scmp.lt.s32.totalorder %s4211_s15, %s4211_s15 }
   0xd   : > { %p4008_p9 = pnand %p4011_p6, %p4007_p8 }
   0xe   : > { %p4221_p2 = por %p4220_p1, %p4219_p0 }
   0xf   : > { %p4202_p10 = pneg %p4008_p9 }
  0x11   : > { %p4214_p12 = pnand %p4212_p11, %p4202_p10 }
  0x13   : > { %p4215_p13 = pneg %p4214_p12 }
  0x15   : > { %p4222_p3 = pnand %p4221_p2, %p4215_p13 }
  0x17   : > { %4225 = shalt.err (!%p4222_p3)
}
  0x18   : > { %4010 = dma.hbm_to_vmem [thread:$0]  (!%p4008_p9), %s4992_s6, 64, %s344_s14, [#allocation3]  }
  0x19   : > { %392 = sbr.rel (%p4364_p7) target bundleno = 7318 (0x1c96), region = 68 }
  0x1e   : > { %4239 = dma.done.wait (%p4011_p6), [#allocation3], 64  }
  0x1f   : > { %4241 = vsyncadd (%p4011_p6), [#allocation3], 4294967232  ;;  %v4255_v0 = vmov 0.0   ;;  %p440_p5 = scmp.lt.s32.totalorder %s4347_s24, 1  ;;  %vm4256_vm0 = vmmov 0   ;;  %vm531_vm1 = vcmask 1045504   ;;  %v453_v14 = vlaneseq }
  0x20   : > { %3704 = vmatprep.subr.bf16.mxu0 %v4255_v0  ;;  %3710 = vmatprep.subr.bf16.mxu1 %v4255_v0  ;;  %vm586_vm2 = vcmask 1043456   ;;  %v4052_v1 = vld [vmem:[%s4989_s3] sm:$0x3f]   ;;  %vm527_vm3 = vcmask 97280   ;;  %vm582_vm4 = vcmask 64512   ;;  %vm644_vm5 = vcmask 130048  }
  0x21   : > { %3706 = vmatprep.mubr.msk.bf16.mxu0 %vm4256_vm0, %v4255_v0  ;;  %3712 = vmatprep.mubr.msk.bf16.mxu1 %vm4256_vm0, %v4255_v0  ;;  %s441_s18 = scalar_select %p440_p5, %s4347_s24, 1  ;;  %v577_v2 = vld [vmem:[%s4990_s4] sm:$0xf]  ;;  %v533_v5 = vsel %vm531_vm1, %v4052_v1, 0  ;;  %v4054_v12 = vld [vmem:[%s4993_s7 + $0x8] sm:$0xff]   ;;  %v4412_v15 = vshrl.u32 %v453_v14, 7 }
  0x22   : > { %v588_v6 = vsel %vm586_vm2, %v577_v2, 0  ;;  %3705 = vmatpush3.bf16.msra.mxu0 %v533_v5  ;;  %v4053_v9 = vld [vmem:[%s4991_s5] sm:$0xff]   ;;  %vm711_vm6 = vcmask 261120   ;;  %s4257_s17 = smov 96   ;;  %v458_v61 = vand.u32 127, %v453_v14  ;;  %vm843_vm9 = vcmask 195584  }
  0x23   : > { %s3454_s19 = sshll.u32 %s441_s18, 3  ;;  %3711 = vmatpush3.bf16.msra.mxu1 %v588_v6  ;;  %3716 = vmatprep.subr.bf16.mxu0 %v4255_v0  ;;  %v4055_v13 = vld [vmem:[%s4993_s7] sm:$0xff]   ;;  %v4415_v16 = vsub.s32 0, %v4412_v15  ;;  %v4418_v17 = vsub.s32 1, %v4412_v15  ;;  %v4427_v25 = vsub.s32 2, %v4412_v15  ;;  %v456_v60 = vadd.s32 16, %v4412_v15 }
  0x24   : > { %s443_s26 = scalar_lea.vmem %s4986_s0, %s3454_s19  ;;  %s447_s13 = scalar_lea.vmem %s4987_s1, %s3454_s19  ;;  %v513_v18 = vld [vmem:[#allocation2] sm:$0x7]  ;;  %v499_v63 = vand.u32 7, %v458_v61  ;;  %v455_v1 = vadd.s32 8, %v4412_v15 }
  0x25   : > { %v514_v3 = vld [vmem:[%s443_s26] sm:$0xff]  ;;  %s451_s23 = scalar_lea.vmem %s4988_s2, %s3454_s19  ;;  %v521_v19 = vrot.slane %v513_v18, %v4415_v16  ;;  %v581_v20 = vrot.slane %v513_v18, %v4418_v17  ;;  %v637_v31 = vrot.slane %v513_v18, %v4427_v25  ;;  %v477_v62 = vand.u32 7, %v456_v60  ;;  %s4259_s18 = smov 88  }
  0x26   : > { %v575_v4 = vld [vmem:[%s447_s13] sm:$0xff]  ;;  %v515_v7 = vpack.c.bf16 %v514_v3, %v514_v3  ;;  %v470_v2 = vand.u32 7, %v455_v1  ;;  %v4258_v3 = vmov -1e+30   ;;  %s4260_s20 = smov 64   ;;  %s5011_s19 = smov 56  }
  0x27   : > { %v576_v8 = vpack.c.bf16 %v575_v4, %v575_v4  ;;  %v630_v10 = vld [vmem:[%s451_s23] sm:$0xff]  ;;  %vm509_vm7 = vcmp.eq.s32.totalorder %v477_v62, %v499_v63  ;;  %s4261_s23 = smov 120   ;;  %s5009_s26 = smov 80  }
  0x28   : > { %3707 = vmatmul.mubr.msk.bf16.vlgmr.msra.gmra.mxu0 %vm527_vm3, %v515_v7  ;;  %v631_v11 = vpack.c.bf16 %v630_v10, %v630_v10  ;;  %v4441_v40 = vld [vmem:[%s4997_s11] sm:$0xff]  ;;  %v4468_v4 = vsel %vm509_vm7, 0.0, %v4258_v3  ;;  %vm508_vm10 = vcmp.eq.s32.totalorder %v470_v2, %v499_v63  ;;  %s5007_s13 = smov 112   ;;  %s5005_s14 = smov 72  }
  0x29   : > { %3713 = vmatmul.mubr.msk.bf16.vlgmr.msra.gmra.mxu1 %vm582_vm4, %v576_v8  ;;  %3717 = vmatpush3.bf16.msra.mxu0 %v4053_v9  ;;  %v698_v41 = vrot.slane %v4441_v40, %v4415_v16  ;;  %s5003_s15 = smov 104   ;;  %s4999_s30 = smov 48  }
  0x2a   : > { %3718 = vmatprep.mubr.msk.bf16.mxu0 %vm4256_vm0, %v4255_v0  ;;  %3722 = vmatprep.subr.bf16.mxu0 %v4054_v12  ;;  %v463_v0 = vand.u32 7, %v4412_v15  ;;  %s5020_s27 = smov 48  }
  0x2c   : > { %vm507_vm8 = vcmp.eq.s32.totalorder %v463_v0, %v499_v63  ;;  %v773_v0 = vld [vmem:[%s4994_s8] sm:$0xf] }
  0x2d   : > { %v4470_v6 = vsel %vm507_vm8, 0.0, %v4258_v3  ;;  %v1176_v1 = vsel %vm586_vm2, %v773_v0, 0 }
  0x30   : > { %3719 = vmatmul.mubr.msk.bf16.vlgmr.msra.gmra.mxu0 %vm644_vm5, %v631_v11 }
  0x31   : > { %3723 = vmatpush3.bf16.msra.mxu0 %v4054_v12  ;;  %v4475_v12 = vsel %vm508_vm10, 0.0, %v4258_v3 }
  0x32   : > { %3724 = vmatprep.subr.bf16.mxu0 %v4055_v13 }
  0x35   : > { %3725 = vmatpush3.bf16.msra.mxu0 %v4055_v13 }
  0xe8   : > { %v569_v21 = vpop.f32.mrf.mxu0 }
  0xe9   : > { %v624_v22 = vpop.f32.mrf.mxu1  ;;  %v4422_v23 = vadd.f32 %v569_v21, %v521_v19 }
  0xea   : > { %v4424_v24 = vadd.f32 %v624_v22, %v581_v20  ;;  %v3708_v26 = vpop.f32.mrf.mxu0 }
  0xeb   : > { %v3714_v27 = vpop.f32.mrf.mxu1 }
  0xec   : > { %v689_v28 = vpack.c.bf16 %v4424_v24, %v4422_v23  ;;  %v572_v29 = vpop.f32.mrf.mxu0 }
  0xed   : > { %v627_v30 = vpop.f32.mrf.mxu1 }
  0xee   : > { %3726 = vmatprep.mubr.msk.bf16.mxu0 %vm711_vm6, %v689_v28  ;;  %v3709_v32 = vpop.f32.mrf.mxu0 }
  0xef   : > { %v3715_v33 = vpop.f32.mrf.mxu1 }
  0xf0   : > { %v682_v34 = vpop.f32.mrf.mxu0 }
  0xf1   : > { %v4433_v35 = vadd.f32 %v682_v34, %v637_v31 }
  0xf2   : > { %v3720_v36 = vpop.f32.mrf.mxu0 }
  0xf3   : > { %v690_v37 = vpack.c.bf16 %v4433_v35, %v4433_v35 }
  0xf4   : > { %v685_v38 = vpop.f32.mrf.mxu0 }
  0xf5   : > { %3727 = vmatmul.mubr.msk.bf16.vlgmr.msra.gmra.mxu0 %vm711_vm6, %v690_v37 }
  0xf6   : > { %v3721_v39 = vpop.f32.mrf.mxu0 }
 0x1b5   : > { %v3728_v42 = vpop.f32.mrf.mxu0 }
 0x1b6   : > { %v761_v43 = vadd.f32 %v3728_v42, %v698_v41 }
 0x1b7   : > { %v752_v44 = vpop.f32.mrf.mxu0 }
 0x1b8   : > { %v4445_v45 = vpack.c.bf16 %v761_v43, %v761_v43  ;;  %v753_v47 = vadd.f32 %v752_v44, %v698_v41  ;;  %v768_v58 = vmul.f32 0.35355338, %v761_v43 }
 0x1b9   : > { %v3729_v46 = vpop.f32.mrf.mxu0 }
 0x1ba   : > { %781 = vrot.lane.b32.xlu0 %v4445_v45, %s4257_s17  ;;  %v766_v50 = vmul.f32 0.35355338, %v753_v47  ;;  %v4461_v59 = vpack.c.bf16 %v768_v58, %v768_v58 }
 0x1bb   : > { %v755_v48 = vpop.f32.mrf.mxu0 }
 0x1bc   : > { %v756_v49 = vadd.f32 %v755_v48, %v698_v41 }
 0x1be   : > { %v767_v51 = vmul.f32 0.35355338, %v756_v49  ;;  %v4449_v52 = vpack.c.bf16 %v756_v49, %v753_v47 }
 0x1c0   : > { %v4451_v53 = vpack.c.bf16 %v767_v51, %v766_v50  ;;  %779 = vrot.lane.b32.xlu0 %v4449_v52, %s4257_s17 }
 0x1c2   : > { %3734 = vmatprep.mubr.msk.bf16.mxu0 %vm582_vm4, %v4451_v53 }
 0x22c   : > { %v782_v54 = vpop.permute.xlu0 %781 }
 0x22d   : > { %3970 = vmatprep.subr.msk.bf16.mxu0 %vm582_vm4, %v782_v54  ;;  %v793_v55 = vsel %vm582_vm4, %v782_v54, 0 }
 0x22e   : > { %3731 = vmatpush3.bf16.xpose.msra.mxu0 %v793_v55 }
 0x232   : > { %v780_v56 = vpop.permute.xlu0 %779 }
 0x233   : > { %3971 = vmatprep.subr.msk.bf16.mxu0 %vm582_vm4, %v780_v56  ;;  %v790_v57 = vsel %vm582_vm4, %v780_v56, 0 }
 0x236   : > { %3733 = vmatpush3.bf16.xpose.msra.mxu0 %v790_v57 }
 0x23d   : > { %3735 = vmatmul.mubr.msk.bf16.vlgmr.msra.gmra.mxu0 %vm582_vm4, %v4461_v59 }
 0x2fd   : > { %v3736_v5 = vpop.f32.mrf.mxu0 }
 0x2fe   : > { %v838_v7 = vadd.f32 %v3736_v5, %v4468_v4 }
 0x2ff   : > { %v829_v8 = vpop.f32.mrf.mxu0 }
 0x300   : > { %v830_v9 = vadd.f32 %v829_v8, %v4470_v6  ;;  %v850_v10 = vsel %vm843_vm9, %v838_v7, -inf }
 0x301   : > { %851 = vmax.xlane.f32.xlu0 %v850_v10  ;;  %v3737_v11 = vpop.f32.mrf.mxu0 }
 0x302   : > { %v844_v13 = vsel %vm843_vm9, %v830_v9, -inf }
 0x303   : > { %v832_v14 = vpop.f32.mrf.mxu0  ;;  %845 = vmax.xlane.f32.xlu1 %v844_v13 }
 0x304   : > { %v833_v18 = vadd.f32 %v832_v14, %v4475_v12 }
 0x306   : > { %v847_v19 = vsel %vm843_vm9, %v833_v18, -inf }
 0x307   : > { %848 = vmax.xlane.f32.xlu1 %v847_v19 }
 0x317   : > { %951 = vrot.lane.b32.xlu0 %v4445_v45, %s4259_s18 }
 0x318   : > { %881 = vrot.lane.b32.xlu1 %v4445_v45, %s4260_s20 }
 0x38a   : > { %v852_v20 = vpop.xlane.xlu0 %851 }
 0x38b   : > { %v855_v21 = vsub.f32 %v838_v7, %v852_v20 }
 0x38c   : > { %v846_v22 = vpop.xlane.xlu1 %845 }
 0x38d   : > { %v860_v26 = vmul.f32 1.442695, %v855_v21  ;;  %v853_v27 = vsub.f32 %v830_v9, %v846_v22 }
 0x38e   : > { %v952_v47 = vpop.permute.xlu0 %951 }
 0x38f   : > { %4078 = vpow2.f32 %v860_v26  ;;  %v856_v28 = vmul.f32 1.442695, %v853_v27  ;;  %v963_v61 = vsel %vm582_vm4, %v952_v47, 0 }
 0x390   : > { %v849_v29 = vpop.xlane.xlu1 %848 }
 0x391   : > { %4080 = vpow2.f32 %v856_v28  ;;  %v854_v30 = vsub.f32 %v833_v18, %v849_v29 }
 0x393   : > { %v858_v31 = vmul.f32 1.442695, %v854_v30 }
 0x394   : > { %v882_v32 = vpop.permute.xlu1 %881 }
 0x395   : > { %4082 = vpow2.f32 %v858_v31  ;;  %3972 = vmatprep.subr.msk.bf16.mxu1 %vm586_vm2, %v882_v32  ;;  %v891_v33 = vsel %vm586_vm2, %v882_v32, 0 }
 0x396   : > { %3739 = vmatpush3.bf16.msra.mxu1 %v891_v33 }
 0x39c   : > { %v4079_v34 = vpop.eup %4078 }
 0x39d   : > { %v868_v36 = vsel %vm843_vm9, %v4079_v34, 0.0 }
 0x39e   : > { %v4081_v37 = vpop.eup %4080  ;;  %869 = vadd.xlane.f32.xlu1 %v868_v36 }
 0x39f   : > { %v862_v38 = vsel %vm843_vm9, %v4081_v37, 0.0 }
 0x3a2   : > { %v4083_v39 = vpop.eup %4082  ;;  %863 = vadd.xlane.f32.xlu1 %v862_v38 }
 0x3a3   : > { %v865_v41 = vsel %vm843_vm9, %v4083_v39, 0.0 }
 0x3a6   : > { %866 = vadd.xlane.f32.xlu1 %v865_v41 }
 0x3b7   : > { %879 = vrot.lane.b32.xlu1 %v4449_v52, %s4260_s20 }
 0x3bb   : > { %949 = vrot.lane.b32.xlu1 %v4449_v52, %s4259_s18 }
 0x3bf   : > { %945 = vrot.lane.b32.xlu1 %v4451_v53, %s4261_s23 }
 0x3c3   : > { %947 = vrot.lane.b32.xlu1 %v4461_v59, %s4261_s23 }
 0x427   : > { %v870_v42 = vpop.xlane.xlu1 %869 }
 0x428   : > { %4084 = vrcp.f32 %v870_v42 }
 0x42b   : > { %v864_v43 = vpop.xlane.xlu1 %863 }
 0x42c   : > { %4086 = vrcp.f32 %v864_v43 }
 0x42f   : > { %v867_v44 = vpop.xlane.xlu1 %866 }
 0x430   : > { %4088 = vrcp.f32 %v867_v44 }
 0x433   : > { %v880_v46 = vpop.permute.xlu1 %879 }
 0x434   : > { %3740 = vmatprep.subr.bf16.mxu1 %v880_v46 }
 0x435   : > { %3741 = vmatpush3.bf16.msra.mxu1 %v880_v46  ;;  %v4085_v48 = vpop.eup %4084 }
 0x436   : > { %3973 = vmatprep.subr.msk.bf16.mxu1 %vm582_vm4, %v952_v47  ;;  %v876_v54 = vmul.f32 %v4085_v48, %v4079_v34 }
 0x437   : > { %v950_v51 = vpop.permute.xlu1 %949 }
 0x438   : > { %v878_v58 = vpack.c.bf16 %v876_v54, %v876_v54  ;;  %v960_v62 = vsel %vm582_vm4, %v950_v51, 0 }
 0x439   : > { %v4087_v49 = vpop.eup %4086 }
 0x43a   : > { %v874_v55 = vmul.f32 %v4087_v49, %v4081_v37 }
 0x43b   : > { %v946_v60 = vpop.permute.xlu1 %945 }
 0x43d   : > { %v4089_v50 = vpop.eup %4088 }
 0x43e   : > { %v875_v56 = vmul.f32 %v4089_v50, %v4083_v39 }
 0x43f   : > { %v948_v63 = vpop.permute.xlu1 %947 }
 0x440   : > { %v877_v57 = vpack.c.bf16 %v875_v56, %v874_v55 }
 0x442   : > { %3742 = vmatprep.mubr.msk.bf16.mxu1 %vm843_vm9, %v877_v57 }
 0x443   : > { %3743 = vmatmul.mubr.msk.bf16.vlgmr.msra.gmra.mxu1 %vm843_vm9, %v878_v58 }
 0x444   : > { %3747 = vmatpush3.bf16.xpose.msra.mxu1 %v963_v61  ;;  %3750 = vmatprep.mubr.msk.bf16.mxu1 %vm582_vm4, %v946_v60 }
 0x445   : > { %3974 = vmatprep.subr.msk.bf16.mxu1 %vm582_vm4, %v950_v51 }
 0x44c   : > { %3749 = vmatpush3.bf16.xpose.msra.mxu1 %v960_v62 }
 0x44d   : > { %3977 = vmatprep.subr.msk.bf16.mxu1 %vm586_vm2, %v773_v0 }
 0x453   : > { %3751 = vmatmul.mubr.msk.bf16.vlgmr.msra.gmra.mxu1 %vm582_vm4, %v948_v63 }
 0x454   : > { %3769 = vmatpush3.bf16.msra.mxu1 %v1176_v1 }
 0x503   : > { %v3744_v2 = vpop.f32.mrf.mxu1 }
 0x504   : > { %v942_v9 = vpack.c.bf16 %v3744_v2, %v3744_v2 }
 0x505   : > { %v927_v3 = vpop.f32.mrf.mxu1 }
 0x507   : > { %v3745_v5 = vpop.f32.mrf.mxu1 }
 0x509   : > { %v930_v7 = vpop.f32.mrf.mxu1 }
 0x50a   : > { %v941_v8 = vpack.c.bf16 %v930_v7, %v927_v3 }
 0x50c   : > { %3770 = vmatprep.mubr.msk.bf16.mxu1 %vm582_vm4, %v941_v8 }
 0x50d   : > { %3771 = vmatmul.mubr.msk.bf16.vlgmr.msra.gmra.mxu1 %vm582_vm4, %v942_v9 }
 0x513   : > { %v3752_v10 = vpop.f32.mrf.mxu1 }
 0x514   : > { %v1008_v18 = vadd.f32 %v3752_v10, %v4468_v4 }
 0x515   : > { %v999_v11 = vpop.f32.mrf.mxu1 }
 0x516   : > { %v1000_v13 = vadd.f32 %v999_v11, %v4470_v6  ;;  %v1019_v26 = vsel %vm843_vm9, %v1008_v18, -inf }
 0x517   : > { %v3753_v14 = vpop.f32.mrf.mxu1 }
 0x518   : > { %v1013_v19 = vsel %vm843_vm9, %v1000_v13, -inf }
 0x519   : > { %v1002_v20 = vpop.f32.mrf.mxu1  ;;  %1014 = vmax.xlane.f32.xlu1 %v1013_v19 }
 0x51a   : > { %v1003_v21 = vadd.f32 %v1002_v20, %v4475_v12 }
 0x51c   : > { %v1016_v22 = vsel %vm843_vm9, %v1003_v21, -inf }
 0x51d   : > { %1017 = vmax.xlane.f32.xlu0 %v1016_v22  ;;  %1020 = vmax.xlane.f32.xlu1 %v1019_v26 }
 0x5a2   : > { %v1015_v27 = vpop.xlane.xlu1 %1014 }
 0x5a3   : > { %v1022_v28 = vsub.f32 %v1000_v13, %v1015_v27 }
 0x5a5   : > { %v1025_v36 = vmul.f32 1.442695, %v1022_v28 }
 0x5a6   : > { %v1018_v29 = vpop.xlane.xlu0 %1017  ;;  %v1021_v30 = vpop.xlane.xlu1 %1020 }
 0x5a7   : > { %v1023_v31 = vsub.f32 %v1003_v21, %v1018_v29  ;;  %v1024_v32 = vsub.f32 %v1008_v18, %v1021_v30 }
 0x5a9   : > { %v1027_v33 = vmul.f32 1.442695, %v1023_v31  ;;  %v1029_v34 = vmul.f32 1.442695, %v1024_v32 }
 0x5ab   : > { %4090 = vpow2.f32 %v1027_v33 }
 0x5ac   : > { %4092 = vpow2.f32 %v1029_v34 }
 0x5ad   : > { %4094 = vpow2.f32 %v1025_v36 }
 0x5b8   : > { %v4091_v37 = vpop.eup %4090 }
 0x5b9   : > { %v4093_v38 = vpop.eup %4092  ;;  %v1034_v39 = vsel %vm843_vm9, %v4091_v37, 0.0 }
 0x5ba   : > { %1035 = vadd.xlane.f32.xlu1 %v1034_v39  ;;  %v1037_v41 = vsel %vm843_vm9, %v4093_v38, 0.0  ;;  %v4095_v42 = vpop.eup %4094 }
 0x5bb   : > { %1038 = vadd.xlane.f32.xlu0 %v1037_v41  ;;  %v1031_v43 = vsel %vm843_vm9, %v4095_v42, 0.0 }
 0x5bf   : > { %1032 = vadd.xlane.f32.xlu0 %v1031_v43 }
 0x5cb   : > { %1050 = vrot.lane.b32.xlu1 %v4445_v45, %s5011_s19 }
 0x5cd   : > { %v4523_v44 = vpop.f32.mrf.mxu1 }
 0x5cf   : > { %1232 = vrot.lane.b32.xlu1 %v4445_v45, %s5009_s26  ;;  %v4527_v46 = vpop.f32.mrf.mxu1 }
 0x5d1   : > { %v3773_v47 = vpop.f32.mrf.mxu1 }
 0x5d3   : > { %1230 = vrot.lane.b32.xlu1 %v4449_v52, %s5009_s26 }
 0x5d5   : > { %1048 = vrot.lane.b32.xlu0 %v4449_v52, %s5011_s19 }
 0x5d7   : > { %1228 = vrot.lane.b32.xlu1 %v4461_v59, %s5007_s13 }
 0x5d9   : > { %1226 = vrot.lane.b32.xlu0 %v4451_v53, %s5007_s13  ;;  %s5018_s13 = smov 72  }
 0x5db   : > { %1457 = vrot.lane.b32.xlu1 %v4449_v52, %s5005_s14 }
 0x5dd   : > { %1459 = vrot.lane.b32.xlu0 %v4445_v45, %s5005_s14  ;;  %s5019_s14 = smov 104  }
 0x5df   : > { %1455 = vrot.lane.b32.xlu1 %v4461_v59, %s5003_s15  ;;  %v774_v59 = vld [vmem:[%s4994_s8 + $0x4] sm:$0xf] }
 0x5e0   : > { %v1119_v0 = vsel %vm586_vm2, %v774_v59, 0 }
 0x5e1   : > { %1453 = vrot.lane.b32.xlu0 %v4451_v53, %s5003_s15 }
 0x643   : > { %v1036_v48 = vpop.xlane.xlu1 %1035 }
 0x644   : > { %v1039_v49 = vpop.xlane.xlu0 %1038 }
 0x645   : > { %4096 = vrcp.f32 %v1039_v49 }
 0x646   : > { %4098 = vrcp.f32 %v1036_v48 }
 0x647   : > { %v1051_v50 = vpop.permute.xlu1 %1050 }
 0x648   : > { %v1033_v51 = vpop.xlane.xlu0 %1032  ;;  %v1060_v54 = vsel %vm586_vm2, %v1051_v50, 0  ;;  %3975 = vmatprep.subr.msk.bf16.mxu0 %vm586_vm2, %v1051_v50 }
 0x649   : > { %4100 = vrcp.f32 %v1033_v51  ;;  %3755 = vmatpush3.bf16.msra.mxu0 %v1060_v54 }
 0x64b   : > { %v1233_v1 = vpop.permute.xlu1 %1232 }
 0x64c   : > { %v1049_v55 = vpop.permute.xlu0 %1048  ;;  %v1244_v10 = vsel %vm582_vm4, %v1233_v1, 0 }
 0x64d   : > { %3756 = vmatprep.subr.bf16.mxu0 %v1049_v55 }
 0x64e   : > { %3757 = vmatpush3.bf16.msra.mxu0 %v1049_v55 }
 0x64f   : > { %3976 = vmatprep.subr.msk.bf16.mxu0 %vm586_vm2, %v774_v59  ;;  %v1231_v13 = vpop.permute.xlu1 %1230 }
 0x650   : > { %v1227_v11 = vpop.permute.xlu0 %1226  ;;  %v1241_v14 = vsel %vm582_vm4, %v1231_v13, 0 }
 0x652   : > { %v4097_v53 = vpop.eup %4096 }
 0x653   : > { %v4099_v56 = vpop.eup %4098  ;;  %v1045_v58 = vmul.f32 %v4097_v53, %v4093_v38  ;;  %v1229_v19 = vpop.permute.xlu1 %1228 }
 0x654   : > { %v1044_v61 = vmul.f32 %v4099_v56, %v4091_v37  ;;  %v1460_v18 = vpop.permute.xlu0 %1459 }
 0x655   : > { %v1047_v63 = vpack.c.bf16 %v1045_v58, %v1045_v58  ;;  %v1471_v20 = vsel %vm582_vm4, %v1460_v18, 0 }
 0x656   : > { %v4101_v57 = vpop.eup %4100 }
 0x657   : > { %v1043_v60 = vmul.f32 %v4101_v57, %v4095_v42  ;;  %v1458_v22 = vpop.permute.xlu1 %1457 }
 0x658   : > { %v1454_v21 = vpop.permute.xlu0 %1453  ;;  %v1468_v26 = vsel %vm582_vm4, %v1458_v22, 0 }
 0x659   : > { %v1046_v62 = vpack.c.bf16 %v1044_v61, %v1043_v60 }
 0x65b   : > { %3758 = vmatprep.mubr.msk.bf16.mxu0 %vm843_vm9, %v1046_v62  ;;  %v1456_v27 = vpop.permute.xlu1 %1455 }
 0x65c   : > { %3759 = vmatmul.mubr.msk.bf16.vlgmr.msra.gmra.mxu0 %vm843_vm9, %v1047_v63 }
 0x65d   : > { %3763 = vmatpush3.bf16.msra.mxu0 %v1119_v0 }
 0x65e   : > { %3978 = vmatprep.subr.msk.bf16.mxu0 %vm582_vm4, %v1233_v1 }
 0x71c   : > { %v3760_v2 = vpop.f32.mrf.mxu0 }
 0x71d   : > { %v1111_v9 = vpack.c.bf16 %v3760_v2, %v3760_v2 }
 0x71e   : > { %v1096_v3 = vpop.f32.mrf.mxu0 }
 0x720   : > { %v3761_v5 = vpop.f32.mrf.mxu0 }
 0x722   : > { %v1099_v7 = vpop.f32.mrf.mxu0 }
 0x723   : > { %v1110_v8 = vpack.c.bf16 %v1099_v7, %v1096_v3 }
 0x725   : > { %3764 = vmatprep.mubr.msk.bf16.mxu0 %vm582_vm4, %v1110_v8 }
 0x726   : > { %3765 = vmatmul.mubr.msk.bf16.vlgmr.msra.gmra.mxu0 %vm582_vm4, %v1111_v9 }
 0x727   : > { %3775 = vmatpush3.bf16.xpose.msra.mxu0 %v1244_v10  ;;  %3778 = vmatprep.mubr.msk.bf16.mxu0 %vm582_vm4, %v1227_v11 }
 0x728   : > { %3979 = vmatprep.subr.msk.bf16.mxu0 %vm582_vm4, %v1231_v13 }
 0x72f   : > { %3777 = vmatpush3.bf16.xpose.msra.mxu0 %v1241_v14 }
 0x730   : > { %3982 = vmatprep.subr.msk.bf16.mxu0 %vm582_vm4, %v1460_v18 }
 0x736   : > { %3779 = vmatmul.mubr.msk.bf16.vlgmr.msra.gmra.mxu0 %vm582_vm4, %v1229_v19 }
 0x737   : > { %3797 = vmatpush3.bf16.xpose.msra.mxu0 %v1471_v20  ;;  %3800 = vmatprep.mubr.msk.bf16.mxu0 %vm582_vm4, %v1454_v21 }
 0x738   : > { %3983 = vmatprep.subr.msk.bf16.mxu0 %vm582_vm4, %v1458_v22 }
 0x73f   : > { %3799 = vmatpush3.bf16.xpose.msra.mxu0 %v1468_v26 }
 0x746   : > { %3801 = vmatmul.mubr.msk.bf16.vlgmr.msra.gmra.mxu0 %vm582_vm4, %v1456_v27 }
 0x7e6   : > { %v4568_v28 = vpop.f32.mrf.mxu0 }
 0x7e8   : > { %v4570_v29 = vpop.f32.mrf.mxu0 }
 0x7ea   : > { %v3767_v30 = vpop.f32.mrf.mxu0 }
 0x7ec   : > { %v4572_v31 = vpop.f32.mrf.mxu0 }
 0x7f6   : > { %v3780_v32 = vpop.f32.mrf.mxu0 }
 0x7f7   : > { %v1289_v37 = vadd.f32 %v3780_v32, %v4468_v4 }
 0x7f8   : > { %v1280_v33 = vpop.f32.mrf.mxu0 }
 0x7f9   : > { %v1281_v34 = vadd.f32 %v1280_v33, %v4470_v6  ;;  %v1300_v43 = vsel %vm843_vm9, %v1289_v37, -inf }
 0x7fa   : > { %v3781_v36 = vpop.f32.mrf.mxu0 }
 0x7fb   : > { %v1294_v38 = vsel %vm843_vm9, %v1281_v34, -inf }
 0x7fc   : > { %v1283_v39 = vpop.f32.mrf.mxu0  ;;  %1295 = vmax.xlane.f32.xlu0 %v1294_v38 }
 0x7fd   : > { %v1284_v41 = vadd.f32 %v1283_v39, %v4475_v12 }
 0x7ff   : > { %v1297_v42 = vsel %vm843_vm9, %v1284_v41, -inf }
 0x800   : > { %1298 = vmax.xlane.f32.xlu1 %v1297_v42  ;;  %1301 = vmax.xlane.f32.xlu0 %v1300_v43 }
 0x806   : > { %v3802_v47 = vpop.f32.mrf.mxu0 }
 0x807   : > { %v1516_v7 = vadd.f32 %v3802_v47, %v4468_v4 }
 0x808   : > { %v1507_v48 = vpop.f32.mrf.mxu0 }
 0x809   : > { %v1508_v2 = vadd.f32 %v1507_v48, %v4470_v6  ;;  %v1527_v10 = vsel %vm843_vm9, %v1516_v7, -inf }
 0x80a   : > { %v3803_v49 = vpop.f32.mrf.mxu0 }
 0x80b   : > { %v1521_v8 = vsel %vm843_vm9, %v1508_v2, -inf }
 0x80c   : > { %v1510_v3 = vpop.f32.mrf.mxu0 }
 0x80d   : > { %v1511_v5 = vadd.f32 %v1510_v3, %v4475_v12 }
 0x80f   : > { %v1524_v9 = vsel %vm843_vm9, %v1511_v5, -inf }
 0x885   : > { %v1296_v50 = vpop.xlane.xlu0 %1295 }
 0x886   : > { %v1303_v51 = vsub.f32 %v1281_v34, %v1296_v50 }
 0x888   : > { %v1306_v56 = vmul.f32 1.442695, %v1303_v51 }
 0x889   : > { %v1302_v54 = vpop.xlane.xlu0 %1301  ;;  %v1299_v55 = vpop.xlane.xlu1 %1298 }
 0x88a   : > { %v1305_v59 = vsub.f32 %v1289_v37, %v1302_v54  ;;  %v1304_v53 = vsub.f32 %v1284_v41, %v1299_v55 }
 0x88c   : > { %v1310_v57 = vmul.f32 1.442695, %v1305_v59  ;;  %v1308_v58 = vmul.f32 1.442695, %v1304_v53  ;;  %v775_v53 = vld [vmem:[%s4994_s8 + $0x8] sm:$0xf] }
 0x88e   : > { %4102 = vpow2.f32 %v1310_v57  ;;  %v1215_v57 = vpop.f32.mrf.mxu1 }
 0x88f   : > { %4104 = vpow2.f32 %v1308_v58 }
 0x890   : > { %4106 = vpow2.f32 %v1306_v56  ;;  %v1400_v56 = vsel %vm586_vm2, %v775_v53, 0 }
 0x89b   : > { %v4103_v60 = vpop.eup %4102 }
 0x89c   : > { %v4105_v61 = vpop.eup %4104  ;;  %v1318_v62 = vsel %vm843_vm9, %v4103_v60, 0.0 }
 0x89d   : > { %v4107_v63 = vpop.eup %4106  ;;  %1319 = vadd.xlane.f32.xlu0 %v1318_v62  ;;  %v1315_v0 = vsel %vm843_vm9, %v4105_v61, 0.0 }
 0x89e   : > { %1316 = vadd.xlane.f32.xlu1 %v1315_v0  ;;  %v1312_v1 = vsel %vm843_vm9, %v4107_v63, 0.0 }
 0x8a1   : > { %1313 = vadd.xlane.f32.xlu0 %v1312_v1 }
 0x8af   : > { %1331 = vrot.lane.b32.xlu1 %v4445_v45, %s4999_s30 }
 0x8b7   : > { %1329 = vrot.lane.b32.xlu0 %v4449_v52, %s4999_s30  ;;  %s5001_s30 = smov 40  }
 0x8d3   : > { %1522 = vmax.xlane.f32.xlu1 %v1521_v8 }
 0x8d6   : > { %1525 = vmax.xlane.f32.xlu0 %v1524_v9 }
 0x8d7   : > { %1528 = vmax.xlane.f32.xlu1 %v1527_v10 }
 0x926   : > { %v1320_v11 = vpop.xlane.xlu0 %1319 }
 0x927   : > { %v1317_v13 = vpop.xlane.xlu1 %1316  ;;  %4108 = vrcp.f32 %v1320_v11 }
 0x928   : > { %4110 = vrcp.f32 %v1317_v13 }
 0x92a   : > { %v1314_v14 = vpop.xlane.xlu0 %1313 }
 0x92b   : > { %4112 = vrcp.f32 %v1314_v14  ;;  %v1332_v18 = vpop.permute.xlu1 %1331 }
 0x92c   : > { %v1341_v19 = vsel %vm586_vm2, %v1332_v18, 0  ;;  %3980 = vmatprep.subr.msk.bf16.mxu1 %vm586_vm2, %v1332_v18 }
 0x92d   : > { %3783 = vmatpush3.bf16.msra.mxu1 %v1341_v19  ;;  %v776_v19 = vld [vmem:[%s4994_s8 + $0xc] sm:$0xf] }
 0x92e   : > { %v1330_v20 = vpop.permute.xlu0 %1329 }
 0x92f   : > { %3784 = vmatprep.subr.bf16.mxu1 %v1330_v20 }
 0x931   : > { %3785 = vmatpush3.bf16.msra.mxu1 %v1330_v20  ;;  %v1627_v20 = vsel %vm586_vm2, %v776_v19, 0 }
 0x932   : > { %3981 = vmatprep.subr.msk.bf16.mxu1 %vm586_vm2, %v775_v53 }
 0x934   : > { %v4109_v21 = vpop.eup %4108 }
 0x935   : > { %v4111_v22 = vpop.eup %4110  ;;  %v1326_v27 = vmul.f32 %v4109_v21, %v4103_v60  ;;  %v1221_v21 = vadd.f32 %v4523_v44, %v4568_v28 }
 0x936   : > { %v1325_v32 = vmul.f32 %v4111_v22, %v4105_v61 }
 0x937   : > { %v1328_v34 = vpack.c.bf16 %v1326_v27, %v1326_v27 }
 0x938   : > { %v4113_v26 = vpop.eup %4112 }
 0x939   : > { %v1324_v30 = vmul.f32 %v4113_v26, %v4107_v63  ;;  %v1213_v26 = vadd.f32 %v4527_v46, %v4570_v29 }
 0x93b   : > { %v1327_v33 = vpack.c.bf16 %v1325_v32, %v1324_v30 }
 0x93d   : > { %3786 = vmatprep.mubr.msk.bf16.mxu1 %vm843_vm9, %v1327_v33 }
 0x93e   : > { %3787 = vmatmul.mubr.msk.bf16.vlgmr.msra.gmra.mxu1 %vm843_vm9, %v1328_v34  ;;  %v1216_v34 = vadd.f32 %v1215_v57, %v4572_v31 }
 0x93f   : > { %3791 = vmatpush3.bf16.msra.mxu1 %v1400_v56 }
 0x95c   : > { %v1523_v36 = vpop.xlane.xlu1 %1522 }
 0x95d   : > { %v1530_v37 = vsub.f32 %v1508_v2, %v1523_v36 }
 0x95f   : > { %v1526_v38 = vpop.xlane.xlu0 %1525  ;;  %v1533_v47 = vmul.f32 1.442695, %v1530_v37 }
 0x960   : > { %v1531_v39 = vsub.f32 %v1511_v5, %v1526_v38  ;;  %v1529_v41 = vpop.xlane.xlu1 %1528 }
 0x961   : > { %v1532_v42 = vsub.f32 %v1516_v7, %v1529_v41 }
 0x962   : > { %v1535_v43 = vmul.f32 1.442695, %v1531_v39 }
 0x963   : > { %v1537_v48 = vmul.f32 1.442695, %v1532_v42 }
 0x964   : > { %4114 = vpow2.f32 %v1535_v43 }
 0x965   : > { %4116 = vpow2.f32 %v1537_v48 }
 0x966   : > { %4118 = vpow2.f32 %v1533_v47 }
 0x971   : > { %v4115_v49 = vpop.eup %4114 }
 0x972   : > { %v4117_v50 = vpop.eup %4116  ;;  %v1542_v51 = vsel %vm843_vm9, %v4115_v49, 0.0 }
 0x973   : > { %1543 = vadd.xlane.f32.xlu1 %v1542_v51  ;;  %v1545_v54 = vsel %vm843_vm9, %v4117_v50, 0.0  ;;  %v4119_v55 = vpop.eup %4118 }
 0x974   : > { %1546 = vadd.xlane.f32.xlu0 %v1545_v54  ;;  %v1539_v59 = vsel %vm843_vm9, %v4119_v55, 0.0 }
 0x978   : > { %1540 = vadd.xlane.f32.xlu0 %v1539_v59 }
 0x984   : > { %1558 = vrot.lane.b32.xlu1 %v4445_v45, %s5001_s30 }
 0x98e   : > { %1556 = vrot.lane.b32.xlu0 %v4449_v52, %s5001_s30  ;;  %s437_s30 = sand.u32 1, %s4244_s21  }
 0x9fc   : > { %v1544_v58 = vpop.xlane.xlu1 %1543 }
 0x9fd   : > { %v1547_v60 = vpop.xlane.xlu0 %1546 }
 0x9fe   : > { %v3788_v61 = vpop.f32.mrf.mxu1  ;;  %4120 = vrcp.f32 %v1547_v60 }
 0x9ff   : > { %4122 = vrcp.f32 %v1544_v58  ;;  %v1392_v5 = vpack.c.bf16 %v3788_v61, %v3788_v61 }
 0xa00   : > { %v1377_v62 = vpop.f32.mrf.mxu1  ;;  %v1559_v63 = vpop.permute.xlu1 %1558 }
 0xa01   : > { %v1541_v0 = vpop.xlane.xlu0 %1540  ;;  %3984 = vmatprep.subr.msk.bf16.mxu1 %vm586_vm2, %v1559_v63  ;;  %v1568_v45 = vsel %vm586_vm2, %v1559_v63, 0 }
 0xa02   : > { %4124 = vrcp.f32 %v1541_v0  ;;  %v3789_v1 = vpop.f32.mrf.mxu1 }
 0xa04   : > { %v1380_v2 = vpop.f32.mrf.mxu1 }
 0xa05   : > { %v1391_v3 = vpack.c.bf16 %v1380_v2, %v1377_v62  ;;  %v1557_v52 = vpop.permute.xlu0 %1556 }
 0xa07   : > { %3792 = vmatprep.mubr.msk.bf16.mxu1 %vm582_vm4, %v1391_v3 }
 0xa08   : > { %3793 = vmatmul.mubr.msk.bf16.vlgmr.msra.gmra.mxu1 %vm582_vm4, %v1392_v5 }
 0xa09   : > { %3805 = vmatpush3.bf16.msra.mxu1 %v1568_v45 }
 0xa0a   : > { %3806 = vmatprep.subr.bf16.mxu1 %v1557_v52 }
 0xa0b   : > { %v4121_v7 = vpop.eup %4120 }
 0xa0c   : > { %v4123_v8 = vpop.eup %4122  ;;  %v1553_v10 = vmul.f32 %v4121_v7, %v4117_v50  ;;  %v1686_v50 = vrot.slane %v4441_v40, %v4418_v17 }
 0xa0d   : > { %3807 = vmatpush3.bf16.msra.mxu1 %v1557_v52  ;;  %v1552_v13 = vmul.f32 %v4123_v8, %v4115_v49 }
 0xa0e   : > { %v1555_v18 = vpack.c.bf16 %v1553_v10, %v1553_v10  ;;  %3985 = vmatprep.subr.msk.bf16.mxu1 %vm586_vm2, %v776_v19  ;;  %v4057_v10 = vld [vmem:[%s4995_s9] sm:$0xff]   ;;  %v4062_v19 = vld [vmem:[%s4996_s10 + $0x18] sm:$0xff]  }
 0xa0f   : > { %v4125_v9 = vpop.eup %4124 }
 0xa10   : > { %v1551_v11 = vmul.f32 %v4125_v9, %v4119_v55  ;;  %v4056_v9 = vld [vmem:[%s4995_s9 + $0x8] sm:$0xff]  }
 0xa11   : > { %3818 = vmatprep.subr.bf16.mxu0 %v4056_v9 }
 0xa12   : > { %v1554_v14 = vpack.c.bf16 %v1552_v13, %v1551_v11  ;;  %3819 = vmatpush3.bf16.msra.mxu0 %v4056_v9  ;;  %v4058_v11 = vld [vmem:[%s4996_s10 + $0x38] sm:$0xff]   ;;  %v4059_v13 = vld [vmem:[%s4996_s10 + $0x30] sm:$0xff]  }
 0xa13   : > { %3820 = vmatprep.subr.bf16.mxu0 %v4057_v10 }
 0xa14   : > { %3808 = vmatprep.mubr.msk.bf16.mxu1 %vm843_vm9, %v1554_v14  ;;  %v4060_v14 = vld [vmem:[%s4996_s10 + $0x28] sm:$0xff]  }
 0xa15   : > { %3809 = vmatmul.mubr.msk.bf16.vlgmr.msra.gmra.mxu1 %vm843_vm9, %v1555_v18  ;;  %v4061_v18 = vld [vmem:[%s4996_s10 + $0x20] sm:$0xff]  }
 0xa16   : > { %3813 = vmatpush3.bf16.msra.mxu1 %v1627_v20  ;;  %3821 = vmatpush3.bf16.msra.mxu0 %v4057_v10 }
 0xa17   : > { %3826 = vmatprep.subr.bf16.mxu1 %v4058_v11 }
 0xac8   : > { %v3794_v22 = vpop.f32.mrf.mxu1 }
 0xac9   : > { %v1452_v27 = vadd.f32 %v3794_v22, %v1221_v21 }
 0xaca   : > { %v1436_v30 = vpop.f32.mrf.mxu1 }
 0xacb   : > { %v1450_v32 = vadd.f32 %v1436_v30, %v1213_v26 }
 0xacc   : > { %v3795_v33 = vpop.f32.mrf.mxu1 }
 0xace   : > { %v1439_v36 = vpop.f32.mrf.mxu1 }
 0xacf   : > { %v1451_v37 = vadd.f32 %v1439_v36, %v1216_v34  ;;  %v1732_v36 = vsub.s32 4, %v4412_v15 }
 0xad5   : > { %v3810_v38 = vpop.f32.mrf.mxu1 }
 0xad6   : > { %v1619_v47 = vpack.c.bf16 %v3810_v38, %v3810_v38 }
 0xad7   : > { %v1604_v39 = vpop.f32.mrf.mxu1 }
 0xad9   : > { %v3811_v41 = vpop.f32.mrf.mxu1 }
 0xada   : > { %v1739_v41 = vsub.s32 5, %v4412_v15 }
 0xadb   : > { %v1607_v42 = vpop.f32.mrf.mxu1 }
 0xadc   : > { %v1618_v43 = vpack.c.bf16 %v1607_v42, %v1604_v39  ;;  %v1733_v39 = vrot.slane %v4441_v40, %v1732_v36 }
 0xade   : > { %3814 = vmatprep.mubr.msk.bf16.mxu1 %vm582_vm4, %v1618_v43 }
 0xadf   : > { %3815 = vmatmul.mubr.msk.bf16.vlgmr.msra.gmra.mxu1 %vm582_vm4, %v1619_v47 }
 0xae0   : > { %3827 = vmatpush3.bf16.msra.mxu1 %v4058_v11 }
 0xae1   : > { %3828 = vmatprep.subr.bf16.mxu1 %v4059_v13 }
 0xae4   : > { %3829 = vmatpush3.bf16.msra.mxu1 %v4059_v13 }
 0xae5   : > { %3830 = vmatprep.subr.bf16.mxu1 %v4060_v14 }
 0xae8   : > { %3831 = vmatpush3.bf16.msra.mxu1 %v4060_v14 }
 0xae9   : > { %3832 = vmatprep.subr.bf16.mxu1 %v4061_v18 }
 0xaec   : > { %3833 = vmatpush3.bf16.msra.mxu1 %v4061_v18 }
 0xaed   : > { %3834 = vmatprep.subr.bf16.mxu1 %v4062_v19 }
 0xaf0   : > { %3835 = vmatpush3.bf16.msra.mxu1 %v4062_v19 }
 0xb9f   : > { %v3816_v44 = vpop.f32.mrf.mxu1 }
 0xba0   : > { %v1679_v46 = vadd.f32 %v3816_v44, %v1452_v27 }
 0xba1   : > { %v1663_v28 = vpop.f32.mrf.mxu1 }
 0xba2   : > { %v1677_v29 = vadd.f32 %v1663_v28, %v1450_v32  ;;  %v1682_v49 = vadd.f32 %v1679_v46, %v4433_v35  ;;  %v1740_v46 = vrot.slane %v4441_v40, %v1739_v41 }
 0xba3   : > { %v3817_v48 = vpop.f32.mrf.mxu1 }
 0xba4   : > { %v1680_v31 = vadd.f32 %v1677_v29, %v4422_v23  ;;  %v1689_v56 = vadd.f32 %v1686_v50, %v1682_v49 }
 0xba5   : > { %v1666_v51 = vpop.f32.mrf.mxu1 }
 0xba6   : > { %v1678_v54 = vadd.f32 %v1666_v51, %v1451_v37  ;;  %v1687_v55 = vadd.f32 %v1686_v50, %v1680_v31  ;;  %v1696_v58 = vsel %vm711_vm6, %v1689_v56, 0.0 }
 0xba8   : > { %v1681_v59 = vadd.f32 %v1678_v54, %v4424_v24  ;;  %v1690_v53 = vsel %vm711_vm6, %v1687_v55, 0.0 }
 0xba9   : > { %1691 = vadd.xlane.f32.xlu1 %v1690_v53  ;;  %v4065_v53 = vld [vmem:[%s4996_s10] sm:$0xff]  }
 0xbaa   : > { %v1688_v57 = vadd.f32 %v1686_v50, %v1681_v59  ;;  %v4064_v59 = vld [vmem:[%s4996_s10 + $0x8] sm:$0xff]  }
 0xbac   : > { %v1693_v60 = vsel %vm711_vm6, %v1688_v57, 0.0 }
 0xbad   : > { %1697 = vadd.xlane.f32.xlu1 %v1696_v58  ;;  %1694 = vadd.xlane.f32.xlu0 %v1693_v60 }
 0xc32   : > { %v1692_v23 = vpop.xlane.xlu1 %1691 }
 0xc33   : > { %v1700_v35 = vmul.f32 0.03125, %v1692_v23 }
 0xc35   : > { %v1703_v61 = vsub.f32 %v1687_v55, %v1700_v35  ;;  %v4063_v55 = vld [vmem:[%s4996_s10 + $0x10] sm:$0xff]  }
 0xc36   : > { %v1698_v62 = vpop.xlane.xlu1 %1697  ;;  %v1695_v63 = vpop.xlane.xlu0 %1694  ;;  %3836 = vmatprep.subr.bf16.mxu1 %v4063_v55 }
 0xc37   : > { %v1702_v0 = vmul.f32 0.03125, %v1698_v62  ;;  %v1701_v1 = vmul.f32 0.03125, %v1695_v63  ;;  %v1706_v2 = vmul.f32 %v1703_v61, %v1703_v61  ;;  %3837 = vmatpush3.bf16.msra.mxu1 %v4063_v55 }
 0xc38   : > { %3838 = vmatprep.subr.bf16.mxu1 %v4064_v59 }
 0xc39   : > { %v1705_v24 = vsub.f32 %v1689_v56, %v1702_v0  ;;  %v1704_v3 = vsub.f32 %v1688_v57, %v1701_v1  ;;  %v1709_v5 = vsel %vm711_vm6, %v1706_v2, 0.0  ;;  %v1753_v56 = vrot.slane %v4441_v40, %v4427_v25  ;;  %v4684_v40 = vld [vmem:[%s4997_s11] sm:$0xff] }
 0xc3a   : > { %1710 = vadd.xlane.f32.xlu0 %v1709_v5 }
 0xc3b   : > { %v1708_v45 = vmul.f32 %v1705_v24, %v1705_v24  ;;  %v1707_v52 = vmul.f32 %v1704_v3, %v1704_v3  ;;  %3839 = vmatpush3.bf16.msra.mxu1 %v4064_v59 }
 0xc3c   : > { %3840 = vmatprep.subr.bf16.mxu1 %v4065_v53 }
 0xc3d   : > { %v1715_v7 = vsel %vm711_vm6, %v1708_v45, 0.0  ;;  %v1712_v8 = vsel %vm711_vm6, %v1707_v52, 0.0 }
 0xc3e   : > { %1716 = vadd.xlane.f32.xlu0 %v1715_v7  ;;  %1713 = vadd.xlane.f32.xlu1 %v1712_v8 }
 0xc3f   : > { %3841 = vmatpush3.bf16.msra.mxu1 %v4065_v53 }
 0xcc3   : > { %v1711_v20 = vpop.xlane.xlu0 %1710 }
 0xcc4   : > { %v1718_v21 = vmul.f32 0.03125, %v1711_v20 }
 0xcc6   : > { %v1721_v22 = vadd.f32 1e-05, %v1718_v21 }
 0xcc7   : > { %v1714_v26 = vpop.xlane.xlu1 %1713  ;;  %v1717_v27 = vpop.xlane.xlu0 %1716 }
 0xcc8   : > { %4126 = vrsqrt.f32 %v1721_v22  ;;  %v1719_v30 = vmul.f32 0.03125, %v1714_v26  ;;  %v1720_v32 = vmul.f32 0.03125, %v1717_v27 }
 0xcca   : > { %v1722_v33 = vadd.f32 1e-05, %v1719_v30  ;;  %v1723_v34 = vadd.f32 1e-05, %v1720_v32 }
 0xccc   : > { %4128 = vrsqrt.f32 %v1722_v33 }
 0xccd   : > { %4130 = vrsqrt.f32 %v1723_v34 }
 0xcd5   : > { %v4127_v37 = vpop.eup %4126 }
 0xcd6   : > { %v1727_v38 = vmul.f32 %v4127_v37, %v1703_v61 }
 0xcd8   : > { %v1734_v44 = vmul.f32 %v1733_v39, %v1727_v38 }
 0xcd9   : > { %v4129_v42 = vpop.eup %4128 }
 0xcda   : > { %v4131_v43 = vpop.eup %4130  ;;  %v1728_v47 = vmul.f32 %v4129_v42, %v1704_v3  ;;  %v1741_v49 = vadd.f32 %v1740_v46, %v1734_v44  ;;  %v1843_v3 = vsub.s32 3, %v4412_v15 }
 0xcdb   : > { %v1729_v28 = vmul.f32 %v4131_v43, %v1705_v24 }
 0xcdc   : > { %v1735_v29 = vmul.f32 %v1733_v39, %v1728_v47  ;;  %v1844_v5 = vrot.slane %v4684_v40, %v1843_v3 }
 0xcdd   : > { %v1736_v48 = vmul.f32 %v1733_v39, %v1729_v28  ;;  %v4066_v28 = vld [vmem:[%s4993_s7 + $0x18] sm:$0xff]  }
 0xcde   : > { %v1742_v31 = vadd.f32 %v1740_v46, %v1735_v29  ;;  %v4067_v29 = vld [vmem:[%s4993_s7 + $0x10] sm:$0xff]   ;;  %3846 = vmatprep.subr.bf16.mxu0 %v4066_v28 }
 0xcdf   : > { %v1743_v50 = vadd.f32 %v1740_v46, %v1736_v48 }
 0xce0   : > { %v1744_v51 = vpack.c.bf16 %v1742_v31, %v1741_v49 }
 0xce1   : > { %v1745_v54 = vpack.c.bf16 %v1743_v50, %v1743_v50 }
 0xce2   : > { %3822 = vmatprep.mubr.msk.bf16.mxu0 %vm711_vm6, %v1744_v51 }
 0xce3   : > { %3823 = vmatmul.mubr.msk.bf16.vlgmr.msra.gmra.mxu0 %vm711_vm6, %v1745_v54 }
 0xce4   : > { %3847 = vmatpush3.bf16.msra.mxu0 %v4066_v28 }
 0xce5   : > { %3848 = vmatprep.subr.bf16.mxu0 %v4067_v29 }
 0xce8   : > { %3849 = vmatpush3.bf16.msra.mxu0 %v4067_v29 }
 0xda3   : > { %v3824_v57 = vpop.f32.mrf.mxu0 }
 0xda4   : > { %v1815_v60 = vadd.f32 %v3824_v57, %v1753_v56 }
 0xda5   : > { %v1806_v58 = vpop.f32.mrf.mxu0 }
 0xda6   : > { %v1807_v35 = vadd.f32 %v1806_v58, %v1753_v56  ;;  %v1822_v63 = vmax.f32 %v1815_v60, 0.0 }
 0xda7   : > { %v3825_v23 = vpop.f32.mrf.mxu0 }
 0xda8   : > { %v1820_v0 = vmax.f32 %v1807_v35, 0.0  ;;  %v1824_v24 = vpack.c.bf16 %v1822_v63, %v1822_v63  ;;  %v1992_v23 = vsub.s32 7, %v4412_v15 }
 0xda9   : > { %v1809_v61 = vpop.f32.mrf.mxu0 }
 0xdaa   : > { %v1810_v62 = vadd.f32 %v1809_v61, %v1753_v56  ;;  %v1985_v56 = vsub.s32 6, %v4412_v15 }
 0xdac   : > { %v1821_v1 = vmax.f32 %v1810_v62, 0.0  ;;  %v1986_v60 = vrot.slane %v4684_v40, %v1985_v56 }
 0xdae   : > { %v1823_v2 = vpack.c.bf16 %v1821_v1, %v1820_v0  ;;  %v1993_v1 = vrot.slane %v4684_v40, %v1992_v23  ;;  %v4724_v40 = vld [vmem:[%s4997_s11 + $0x8] sm:$0xff] }
 0xdb0   : > { %3842 = vmatprep.mubr.bf16.mxu1 %v1823_v2 }
 0xdb1   : > { %3843 = vmatmul.mubr.bf16.vlgmr.msra.gmra.mxu1 %v1824_v24 }
 0xe71   : > { %v3844_v45 = vpop.f32.mrf.mxu1 }
 0xe72   : > { %v1936_v7 = vadd.f32 %v3844_v45, %v1844_v5 }
 0xe73   : > { %v1927_v52 = vpop.f32.mrf.mxu1 }
 0xe74   : > { %v1928_v8 = vadd.f32 %v1927_v52, %v1844_v5  ;;  %v1943_v18 = vadd.f32 %v1936_v7, %v1743_v50 }
 0xe75   : > { %v3845_v9 = vpop.f32.mrf.mxu1 }
 0xe76   : > { %v1941_v10 = vadd.f32 %v1928_v8, %v1741_v49  ;;  %v1950_v21 = vsel %vm711_vm6, %v1943_v18, 0.0  ;;  %v2009_v9 = vrot.slane %v4724_v40, %v4415_v16 }
 0xe77   : > { %v1930_v11 = vpop.f32.mrf.mxu1 }
 0xe78   : > { %v1931_v13 = vadd.f32 %v1930_v11, %v1844_v5  ;;  %v1944_v14 = vsel %vm711_vm6, %v1941_v10, 0.0 }
 0xe79   : > { %1945 = vadd.xlane.f32.xlu1 %v1944_v14 }
 0xe7a   : > { %v1942_v19 = vadd.f32 %v1931_v13, %v1742_v31 }
 0xe7c   : > { %v1947_v20 = vsel %vm711_vm6, %v1942_v19, 0.0 }
 0xe7d   : > { %1948 = vadd.xlane.f32.xlu0 %v1947_v20  ;;  %1951 = vadd.xlane.f32.xlu1 %v1950_v21 }
 0xf02   : > { %v1946_v22 = vpop.xlane.xlu1 %1945 }
 0xf03   : > { %v1953_v26 = vmul.f32 0.03125, %v1946_v22 }
 0xf05   : > { %v1956_v27 = vsub.f32 %v1941_v10, %v1953_v26 }
 0xf06   : > { %v1949_v30 = vpop.xlane.xlu0 %1948  ;;  %v1952_v32 = vpop.xlane.xlu1 %1951 }
 0xf07   : > { %v1954_v33 = vmul.f32 0.03125, %v1949_v30  ;;  %v1955_v34 = vmul.f32 0.03125, %v1952_v32  ;;  %v1959_v37 = vmul.f32 %v1956_v27, %v1956_v27 }
 0xf09   : > { %v1957_v38 = vsub.f32 %v1942_v19, %v1954_v33  ;;  %v1958_v39 = vsub.f32 %v1943_v18, %v1955_v34  ;;  %v1962_v42 = vsel %vm711_vm6, %v1959_v37, 0.0 }
 0xf0a   : > { %1963 = vadd.xlane.f32.xlu0 %v1962_v42 }
 0xf0b   : > { %v1960_v43 = vmul.f32 %v1957_v38, %v1957_v38  ;;  %v1961_v47 = vmul.f32 %v1958_v39, %v1958_v39 }
 0xf0d   : > { %v1965_v44 = vsel %vm711_vm6, %v1960_v43, 0.0  ;;  %v1968_v46 = vsel %vm711_vm6, %v1961_v47, 0.0 }
 0xf0e   : > { %1966 = vadd.xlane.f32.xlu1 %v1965_v44  ;;  %1969 = vadd.xlane.f32.xlu0 %v1968_v46 }
 0xf93   : > { %v1964_v48 = vpop.xlane.xlu0 %1963 }
 0xf94   : > { %v1971_v49 = vmul.f32 0.03125, %v1964_v48 }
 0xf96   : > { %v1974_v31 = vadd.f32 1e-05, %v1971_v49 }
 0xf97   : > { %v1970_v50 = vpop.xlane.xlu0 %1969  ;;  %v1967_v51 = vpop.xlane.xlu1 %1966 }
 0xf98   : > { %4132 = vrsqrt.f32 %v1974_v31  ;;  %v1973_v54 = vmul.f32 0.03125, %v1970_v50  ;;  %v1972_v55 = vmul.f32 0.03125, %v1967_v51 }
 0xf9a   : > { %v1976_v59 = vadd.f32 1e-05, %v1973_v54  ;;  %v1975_v53 = vadd.f32 1e-05, %v1972_v55 }
 0xf9c   : > { %4134 = vrsqrt.f32 %v1976_v59 }
 0xf9d   : > { %4136 = vrsqrt.f32 %v1975_v53 }
 0xfa5   : > { %v4133_v57 = vpop.eup %4132 }
 0xfa6   : > { %v1980_v58 = vmul.f32 %v4133_v57, %v1956_v27 }
 0xfa8   : > { %v1987_v0 = vmul.f32 %v1986_v60, %v1980_v58 }
 0xfa9   : > { %v4135_v35 = vpop.eup %4134 }
 0xfaa   : > { %v4137_v61 = vpop.eup %4136  ;;  %v1982_v62 = vmul.f32 %v4135_v35, %v1958_v39  ;;  %v4711_v45 = vadd.f32 %v1993_v1, %v1987_v0 }
 0xfab   : > { %v1981_v63 = vmul.f32 %v4137_v61, %v1957_v38 }
 0xfac   : > { %v1989_v2 = vmul.f32 %v1986_v60, %v1982_v62 }
 0xfad   : > { %v1988_v24 = vmul.f32 %v1986_v60, %v1981_v63 }
 0xfae   : > { %v4709_v5 = vadd.f32 %v1993_v1, %v1989_v2 }
 0xfaf   : > { %v4713_v52 = vadd.f32 %v1993_v1, %v1988_v24 }
 0xfb0   : > { %v2000_v7 = vpack.c.bf16 %v4709_v5, %v4709_v5 }
 0xfb1   : > { %v1999_v8 = vpack.c.bf16 %v4713_v52, %v4711_v45 }
 0xfb3   : > { %3850 = vmatprep.mubr.msk.bf16.mxu0 %vm711_vm6, %v1999_v8 }
 0xfb4   : > { %3851 = vmatmul.mubr.msk.bf16.vlgmr.msra.gmra.mxu0 %vm711_vm6, %v2000_v7 }
0x1074   : > { %v3852_v10 = vpop.f32.mrf.mxu0 }
0x1075   : > { %v2071_v11 = vadd.f32 %v3852_v10, %v2009_v9 }
0x1076   : > { %v2062_v13 = vpop.f32.mrf.mxu0 }
0x1077   : > { %v4728_v14 = vpack.c.bf16 %v2071_v11, %v2071_v11  ;;  %v2063_v19 = vadd.f32 %v2062_v13, %v2009_v9  ;;  %v2078_v16 = vmul.f32 0.35355338, %v2071_v11 }
0x1078   : > { %v3853_v18 = vpop.f32.mrf.mxu0 }
0x1079   : > { %2092 = vrot.lane.b32.xlu1 %v4728_v14, %s4257_s17  ;;  %v2076_v22 = vmul.f32 0.35355338, %v2063_v19  ;;  %v4744_v32 = vpack.c.bf16 %v2078_v16, %v2078_v16 }
0x107a   : > { %v2065_v20 = vpop.f32.mrf.mxu0 }
0x107b   : > { %v2066_v21 = vadd.f32 %v2065_v20, %v2009_v9 }
0x107d   : > { %v2077_v26 = vmul.f32 0.35355338, %v2066_v21  ;;  %v4732_v27 = vpack.c.bf16 %v2066_v21, %v2063_v19  ;;  %2261 = vrot.lane.b32.xlu1 %v4728_v14, %s4259_s18 }
0x107f   : > { %v4736_v30 = vpack.c.bf16 %v2077_v26, %v2076_v22  ;;  %2090 = vrot.lane.b32.xlu0 %v4732_v27, %s4257_s17  ;;  %s5015_s17 = smov 56  }
0x1081   : > { %2259 = vrot.lane.b32.xlu1 %v4732_v27, %s4259_s18  ;;  %3858 = vmatprep.mubr.msk.bf16.mxu0 %vm582_vm4, %v4736_v30  ;;  %s5016_s18 = smov 80  }
0x1083   : > { %2255 = vrot.lane.b32.xlu0 %v4736_v30, %s4261_s23 }
0x1085   : > { %2257 = vrot.lane.b32.xlu1 %v4744_v32, %s4261_s23  ;;  %s5017_s23 = smov 112  }
0x10eb   : > { %v2093_v33 = vpop.permute.xlu1 %2092 }
0x10ec   : > { %v2104_v34 = vsel %vm582_vm4, %v2093_v33, 0  ;;  %3986 = vmatprep.subr.msk.bf16.mxu0 %vm582_vm4, %v2093_v33 }
0x10ed   : > { %3855 = vmatpush3.bf16.xpose.msra.mxu0 %v2104_v34 }
0x10ef   : > { %v2262_v37 = vpop.permute.xlu1 %2261 }
0x10f0   : > { %v2273_v38 = vsel %vm582_vm4, %v2262_v37, 0  ;;  %3989 = vmatprep.subr.msk.bf16.mxu1 %vm582_vm4, %v2262_v37 }
0x10f1   : > { %3871 = vmatpush3.bf16.xpose.msra.mxu1 %v2273_v38  ;;  %v2091_v39 = vpop.permute.xlu0 %2090 }
0x10f2   : > { %3987 = vmatprep.subr.msk.bf16.mxu0 %vm582_vm4, %v2091_v39  ;;  %v2101_v43 = vsel %vm582_vm4, %v2091_v39, 0 }
0x10f3   : > { %v2260_v42 = vpop.permute.xlu1 %2259 }
0x10f4   : > { %3990 = vmatprep.subr.msk.bf16.mxu1 %vm582_vm4, %v2260_v42  ;;  %v2270_v44 = vsel %vm582_vm4, %v2260_v42, 0 }
0x10f5   : > { %3857 = vmatpush3.bf16.xpose.msra.mxu0 %v2101_v43  ;;  %v2256_v47 = vpop.permute.xlu0 %2255 }
0x10f6   : > { %3874 = vmatprep.mubr.msk.bf16.mxu1 %vm582_vm4, %v2256_v47 }
0x10f7   : > { %v2258_v46 = vpop.permute.xlu1 %2257 }
0x10f9   : > { %3873 = vmatpush3.bf16.xpose.msra.mxu1 %v2270_v44 }
0x10fc   : > { %3859 = vmatmul.mubr.msk.bf16.vlgmr.msra.gmra.mxu0 %vm582_vm4, %v4744_v32 }
0x1100   : > { %3875 = vmatmul.mubr.msk.bf16.vlgmr.msra.gmra.mxu1 %vm582_vm4, %v2258_v46 }
0x11bc   : > { %v3860_v28 = vpop.f32.mrf.mxu0 }
0x11bd   : > { %v2149_v50 = vadd.f32 %v3860_v28, %v4468_v4 }
0x11be   : > { %v2140_v29 = vpop.f32.mrf.mxu0 }
0x11bf   : > { %v2141_v48 = vadd.f32 %v2140_v29, %v4470_v6  ;;  %v2160_v60 = vsel %vm843_vm9, %v2149_v50, -inf }
0x11c0   : > { %v3861_v49 = vpop.f32.mrf.mxu0  ;;  %v3876_v31 = vpop.f32.mrf.mxu1 }
0x11c1   : > { %v2154_v51 = vsel %vm843_vm9, %v2141_v48, -inf  ;;  %v2318_v62 = vadd.f32 %v3876_v31, %v4468_v4 }
0x11c2   : > { %v2143_v54 = vpop.f32.mrf.mxu0  ;;  %v2309_v55 = vpop.f32.mrf.mxu1  ;;  %2155 = vmax.xlane.f32.xlu0 %v2154_v51 }
0x11c3   : > { %v2144_v59 = vadd.f32 %v2143_v54, %v4475_v12  ;;  %v2310_v57 = vadd.f32 %v2309_v55, %v4470_v6  ;;  %v2329_v1 = vsel %vm843_vm9, %v2318_v62, -inf }
0x11c4   : > { %v3877_v53 = vpop.f32.mrf.mxu1 }
0x11c5   : > { %v2157_v58 = vsel %vm843_vm9, %v2144_v59, -inf  ;;  %v2323_v0 = vsel %vm843_vm9, %v2310_v57, -inf }
0x11c6   : > { %v2312_v35 = vpop.f32.mrf.mxu1  ;;  %2158 = vmax.xlane.f32.xlu1 %v2157_v58  ;;  %2161 = vmax.xlane.f32.xlu0 %v2160_v60 }
0x11c7   : > { %v2313_v61 = vadd.f32 %v2312_v35, %v4475_v12 }
0x11c9   : > { %v2326_v63 = vsel %vm843_vm9, %v2313_v61, -inf }
0x11ca   : > { %2327 = vmax.xlane.f32.xlu1 %v2326_v63  ;;  %2324 = vmax.xlane.f32.xlu0 %v2323_v0 }
0x11ce   : > { %2330 = vmax.xlane.f32.xlu0 %v2329_v1 }
0x11db   : > { %2191 = vrot.lane.b32.xlu1 %v4728_v14, %s4260_s20 }
0x124b   : > { %v2156_v2 = vpop.xlane.xlu0 %2155 }
0x124c   : > { %v2163_v24 = vsub.f32 %v2141_v48, %v2156_v2 }
0x124e   : > { %v2166_v11 = vmul.f32 1.442695, %v2163_v24 }
0x124f   : > { %v2159_v7 = vpop.xlane.xlu1 %2158  ;;  %v2162_v8 = vpop.xlane.xlu0 %2161 }
0x1250   : > { %v2165_v9 = vsub.f32 %v2149_v50, %v2162_v8  ;;  %v2164_v16 = vsub.f32 %v2144_v59, %v2159_v7  ;;  %v3512_v8 = vld [vmem:[%s4994_s8 + $0x14] sm:$0xf] }
0x1252   : > { %v2170_v10 = vmul.f32 1.442695, %v2165_v9  ;;  %v2168_v37 = vmul.f32 1.442695, %v2164_v16  ;;  %v3511_v16 = vld [vmem:[%s4994_s8 + $0x10] sm:$0xf] }
0x1253   : > { %v2328_v13 = vpop.xlane.xlu1 %2327  ;;  %v2325_v18 = vpop.xlane.xlu0 %2324  ;;  %3993 = vmatprep.subr.msk.bf16.mxu1 %vm586_vm2, %v3511_v16 }
0x1254   : > { %4138 = vpow2.f32 %v2170_v10  ;;  %v2332_v19 = vsub.f32 %v2310_v57, %v2325_v18  ;;  %v2333_v49 = vsub.f32 %v2313_v61, %v2328_v13 }
0x1255   : > { %4140 = vpow2.f32 %v2166_v11 }
0x1256   : > { %v2335_v33 = vmul.f32 1.442695, %v2332_v19  ;;  %v2337_v31 = vmul.f32 1.442695, %v2333_v49 }
0x1257   : > { %v2192_v20 = vpop.permute.xlu1 %2191  ;;  %v2331_v21 = vpop.xlane.xlu0 %2330 }
0x1258   : > { %v2201_v22 = vsel %vm586_vm2, %v2192_v20, 0  ;;  %v2334_v26 = vsub.f32 %v2318_v62, %v2331_v21  ;;  %3988 = vmatprep.subr.msk.bf16.mxu0 %vm586_vm2, %v2192_v20 }
0x1259   : > { %3863 = vmatpush3.bf16.msra.mxu0 %v2201_v22  ;;  %v2429_v22 = vsel %vm586_vm2, %v3512_v8, 0 }
0x125a   : > { %v2339_v34 = vmul.f32 1.442695, %v2334_v26 }
0x125c   : > { %4142 = vpow2.f32 %v2339_v34 }
0x125d   : > { %4144 = vpow2.f32 %v2335_v33  ;;  %v2486_v33 = vsel %vm586_vm2, %v3511_v16, 0 }
0x125e   : > { %4146 = vpow2.f32 %v2168_v37  ;;  %3893 = vmatpush3.bf16.msra.mxu1 %v2486_v33 }
0x125f   : > { %4148 = vpow2.f32 %v2337_v31 }
0x1261   : > { %v4139_v38 = vpop.eup %4138 }
0x1262   : > { %v2178_v39 = vsel %vm843_vm9, %v4139_v38, 0.0  ;;  %v4141_v42 = vpop.eup %4140 }
0x1263   : > { %2179 = vadd.xlane.f32.xlu1 %v2178_v39  ;;  %v2172_v43 = vsel %vm843_vm9, %v4141_v42, 0.0 }
0x1267   : > { %2173 = vadd.xlane.f32.xlu1 %v2172_v43 }
0x1269   : > { %v4780_v47 = vpop.eup %4142 }
0x126a   : > { %v2347_v44 = vsel %vm843_vm9, %v4780_v47, 0.0  ;;  %v4145_v46 = vpop.eup %4144 }
0x126b   : > { %2348 = vadd.xlane.f32.xlu0 %v2347_v44  ;;  %v2341_v28 = vsel %vm843_vm9, %v4145_v46, 0.0  ;;  %v4147_v29 = vpop.eup %4146 }
0x126c   : > { %v2175_v48 = vsel %vm843_vm9, %v4147_v29, 0.0  ;;  %v4149_v50 = vpop.eup %4148 }
0x126d   : > { %v2344_v51 = vsel %vm843_vm9, %v4149_v50, 0.0 }
0x126f   : > { %2342 = vadd.xlane.f32.xlu0 %v2341_v28 }
0x1273   : > { %2176 = vadd.xlane.f32.xlu0 %v2175_v48 }
0x1278   : > { %2360 = vrot.lane.b32.xlu1 %v4728_v14, %s5015_s17 }
0x1289   : > { %2189 = vrot.lane.b32.xlu0 %v4732_v27, %s4260_s20 }
0x128d   : > { %2542 = vrot.lane.b32.xlu0 %v4728_v14, %s5016_s18 }
0x1291   : > { %2536 = vrot.lane.b32.xlu0 %v4736_v30, %s5017_s23 }
0x1295   : > { %2769 = vrot.lane.b32.xlu0 %v4728_v14, %s5018_s13 }
0x1299   : > { %2763 = vrot.lane.b32.xlu0 %v4736_v30, %s5019_s14 }
0x129c   : > { %2345 = vadd.xlane.f32.xlu1 %v2344_v51 }
0x12ad   : > { %2358 = vrot.lane.b32.xlu1 %v4732_v27, %s5015_s17  ;;  %s5021_s17 = smov 40  }
0x12b1   : > { %2540 = vrot.lane.b32.xlu1 %v4732_v27, %s5016_s18 }
0x12b5   : > { %2538 = vrot.lane.b32.xlu1 %v4744_v32, %s5017_s23  ;;  %s4002_s23 = smul.u32 24, %s437_s30 }
0x12b7   : > { %s439_s21 = scalar_lea.vmem [#allocation4], %s4002_s23 }
0x12b9   : > { %2767 = vrot.lane.b32.xlu1 %v4732_v27, %s5018_s13  ;;  %s3571_s13 = sshll.u32 (%p4359_p4), %s4347_s24, 3 }
0x12ba   : > { %s3319_s19 = scalar_lea.vmem (%p4359_p4), %s4998_s12, %s3571_s13 }
0x12bd   : > { %2765 = vrot.lane.b32.xlu1 %v4744_v32, %s5019_s14 }
0x12ec   : > { %v2180_v54 = vpop.xlane.xlu1 %2179 }
0x12ed   : > { %4150 = vrcp.f32 %v2180_v54 }
0x12f0   : > { %v2174_v55 = vpop.xlane.xlu1 %2173 }
0x12f1   : > { %4152 = vrcp.f32 %v2174_v55 }
0x12f4   : > { %v2349_v30 = vpop.xlane.xlu0 %2348  ;;  %v2361_v58 = vpop.permute.xlu1 %2360 }
0x12f5   : > { %v2370_v2 = vsel %vm586_vm2, %v2361_v58, 0 }
0x12f8   : > { %v2343_v59 = vpop.xlane.xlu0 %2342 }
0x12fa   : > { %v4151_v60 = vpop.eup %4150 }
0x12fb   : > { %v2186_v62 = vmul.f32 %v4151_v60, %v4139_v38 }
0x12fc   : > { %v2177_v53 = vpop.xlane.xlu0 %2176 }
0x12fd   : > { %4154 = vrcp.f32 %v2177_v53  ;;  %v2188_v1 = vpack.c.bf16 %v2186_v62, %v2186_v62 }
0x12fe   : > { %v4153_v35 = vpop.eup %4152  ;;  %4156 = vrcp.f32 %v2349_v30 }
0x12ff   : > { %v2184_v63 = vmul.f32 %v4153_v35, %v4141_v42  ;;  %4158 = vrcp.f32 %v2343_v59 }
0x1300   : > { %v2190_v57 = vpop.permute.xlu0 %2189 }
0x1301   : > { %3864 = vmatprep.subr.bf16.mxu0 %v2190_v57 }
0x1302   : > { %3865 = vmatpush3.bf16.msra.mxu0 %v2190_v57 }
0x1303   : > { %3991 = vmatprep.subr.msk.bf16.mxu0 %vm586_vm2, %v2361_v58 }
0x1304   : > { %v2543_v26 = vpop.permute.xlu0 %2542 }
0x1305   : > { %v2554_v49 = vsel %vm582_vm4, %v2543_v26, 0 }
0x1308   : > { %v2537_v31 = vpop.permute.xlu0 %2536 }
0x130a   : > { %v4155_v61 = vpop.eup %4154 }
0x130b   : > { %v2185_v32 = vmul.f32 %v4155_v61, %v4147_v29  ;;  %v4157_v9 = vpop.eup %4156 }
0x130c   : > { %v4159_v10 = vpop.eup %4158  ;;  %v2355_v13 = vmul.f32 %v4157_v9, %v4780_v47  ;;  %v2770_v54 = vpop.permute.xlu0 %2769 }
0x130d   : > { %v2187_v0 = vpack.c.bf16 %v2185_v32, %v2184_v63  ;;  %v2353_v18 = vmul.f32 %v4159_v10, %v4145_v46  ;;  %v2781_v55 = vsel %vm582_vm4, %v2770_v54, 0 }
0x130e   : > { %v2357_v21 = vpack.c.bf16 %v2355_v13, %v2355_v13 }
0x130f   : > { %3866 = vmatprep.mubr.msk.bf16.mxu0 %vm843_vm9, %v2187_v0 }
0x1310   : > { %3867 = vmatmul.mubr.msk.bf16.vlgmr.msra.gmra.mxu0 %vm843_vm9, %v2188_v1  ;;  %v2764_v59 = vpop.permute.xlu0 %2763 }
0x1311   : > { %3879 = vmatpush3.bf16.msra.mxu0 %v2370_v2 }
0x1325   : > { %v2346_v24 = vpop.xlane.xlu1 %2345 }
0x1326   : > { %4160 = vrcp.f32 %v2346_v24 }
0x1329   : > { %v2359_v7 = vpop.permute.xlu1 %2358 }
0x132a   : > { %3880 = vmatprep.subr.bf16.mxu0 %v2359_v7 }
0x132b   : > { %3881 = vmatpush3.bf16.msra.mxu0 %v2359_v7 }
0x132c   : > { %3992 = vmatprep.subr.msk.bf16.mxu0 %vm586_vm2, %v3512_v8 }
0x1333   : > { %v4161_v11 = vpop.eup %4160 }
0x1334   : > { %v2354_v19 = vmul.f32 %v4161_v11, %v4149_v50  ;;  %v2541_v50 = vpop.permute.xlu1 %2540 }
0x1335   : > { %v2551_v51 = vsel %vm582_vm4, %v2541_v50, 0 }
0x1336   : > { %v2356_v20 = vpack.c.bf16 %v2354_v19, %v2353_v18 }
0x1338   : > { %3882 = vmatprep.mubr.msk.bf16.mxu0 %vm843_vm9, %v2356_v20  ;;  %v2539_v30 = vpop.permute.xlu1 %2538 }
0x1339   : > { %3883 = vmatmul.mubr.msk.bf16.vlgmr.msra.gmra.mxu0 %vm843_vm9, %v2357_v21 }
0x133a   : > { %3887 = vmatpush3.bf16.msra.mxu0 %v2429_v22 }
0x133b   : > { %3994 = vmatprep.subr.msk.bf16.mxu0 %vm582_vm4, %v2543_v26 }
0x133c   : > { %v2768_v53 = vpop.permute.xlu1 %2767 }
0x133d   : > { %v2778_v57 = vsel %vm582_vm4, %v2768_v53, 0 }
0x1340   : > { %v2766_v58 = vpop.permute.xlu1 %2765 }
0x13d0   : > { %v3868_v34 = vpop.f32.mrf.mxu0 }
0x13d1   : > { %v2252_v43 = vpack.c.bf16 %v3868_v34, %v3868_v34 }
0x13d2   : > { %v2237_v37 = vpop.f32.mrf.mxu0 }
0x13d4   : > { %v3869_v38 = vpop.f32.mrf.mxu0 }
0x13d6   : > { %v2240_v39 = vpop.f32.mrf.mxu0 }
0x13d7   : > { %v2251_v42 = vpack.c.bf16 %v2240_v39, %v2237_v37 }
0x13d9   : > { %3894 = vmatprep.mubr.msk.bf16.mxu1 %vm582_vm4, %v2251_v42 }
0x13da   : > { %3895 = vmatmul.mubr.msk.bf16.vlgmr.msra.gmra.mxu1 %vm582_vm4, %v2252_v43 }
0x13f9   : > { %v3884_v47 = vpop.f32.mrf.mxu0 }
0x13fa   : > { %v2421_v48 = vpack.c.bf16 %v3884_v47, %v3884_v47 }
0x13fb   : > { %v2406_v44 = vpop.f32.mrf.mxu0 }
0x13fd   : > { %v3885_v46 = vpop.f32.mrf.mxu0 }
0x13ff   : > { %v2409_v28 = vpop.f32.mrf.mxu0 }
0x1400   : > { %v2420_v29 = vpack.c.bf16 %v2409_v28, %v2406_v44 }
0x1402   : > { %3888 = vmatprep.mubr.msk.bf16.mxu0 %vm582_vm4, %v2420_v29 }
0x1403   : > { %3889 = vmatmul.mubr.msk.bf16.vlgmr.msra.gmra.mxu0 %vm582_vm4, %v2421_v48 }
0x1404   : > { %3899 = vmatpush3.bf16.xpose.msra.mxu0 %v2554_v49  ;;  %3902 = vmatprep.mubr.msk.bf16.mxu0 %vm582_vm4, %v2537_v31 }
0x1405   : > { %3995 = vmatprep.subr.msk.bf16.mxu0 %vm582_vm4, %v2541_v50 }
0x140c   : > { %3901 = vmatpush3.bf16.xpose.msra.mxu0 %v2551_v51 }
0x140d   : > { %3998 = vmatprep.subr.msk.bf16.mxu0 %vm582_vm4, %v2770_v54 }
0x1413   : > { %3903 = vmatmul.mubr.msk.bf16.vlgmr.msra.gmra.mxu0 %vm582_vm4, %v2539_v30 }
0x1414   : > { %3921 = vmatpush3.bf16.xpose.msra.mxu0 %v2781_v55  ;;  %3924 = vmatprep.mubr.msk.bf16.mxu0 %vm582_vm4, %v2764_v59 }
0x1415   : > { %3999 = vmatprep.subr.msk.bf16.mxu0 %vm582_vm4, %v2768_v53 }
0x141c   : > { %3923 = vmatpush3.bf16.xpose.msra.mxu0 %v2778_v57 }
0x1423   : > { %3925 = vmatmul.mubr.msk.bf16.vlgmr.msra.gmra.mxu0 %vm582_vm4, %v2766_v58 }
0x149a   : > { %v3896_v60 = vpop.f32.mrf.mxu1 }
0x149c   : > { %v2522_v35 = vpop.f32.mrf.mxu1 }
0x149e   : > { %v3897_v61 = vpop.f32.mrf.mxu1 }
0x14c3   : > { %v3890_v62 = vpop.f32.mrf.mxu0 }
0x14c4   : > { %v4842_v63 = vadd.f32 %v3896_v60, %v3890_v62 }
0x14c5   : > { %v2465_v32 = vpop.f32.mrf.mxu0 }
0x14c6   : > { %v4844_v0 = vadd.f32 %v2522_v35, %v2465_v32 }
0x14c7   : > { %v3891_v1 = vpop.f32.mrf.mxu0 }
0x14c9   : > { %v4846_v2 = vpop.f32.mrf.mxu0 }
0x14d3   : > { %v3904_v24 = vpop.f32.mrf.mxu0 }
0x14d4   : > { %v2599_v10 = vadd.f32 %v3904_v24, %v4468_v4 }
0x14d5   : > { %v2590_v7 = vpop.f32.mrf.mxu0 }
0x14d6   : > { %v2591_v8 = vadd.f32 %v2590_v7, %v4470_v6  ;;  %v2610_v20 = vsel %vm843_vm9, %v2599_v10, -inf }
0x14d7   : > { %v3905_v9 = vpop.f32.mrf.mxu0 }
0x14d8   : > { %v2604_v11 = vsel %vm843_vm9, %v2591_v8, -inf }
0x14d9   : > { %v2593_v13 = vpop.f32.mrf.mxu0  ;;  %2605 = vmax.xlane.f32.xlu0 %v2604_v11 }
0x14da   : > { %v2594_v18 = vadd.f32 %v2593_v13, %v4475_v12 }
0x14dc   : > { %v2607_v19 = vsel %vm843_vm9, %v2594_v18, -inf }
0x14dd   : > { %2608 = vmax.xlane.f32.xlu1 %v2607_v19  ;;  %2611 = vmax.xlane.f32.xlu0 %v2610_v20 }
0x14e3   : > { %v3926_v21 = vpop.f32.mrf.mxu0 }
0x14e4   : > { %v2826_v51 = vadd.f32 %v3926_v21, %v4468_v4 }
0x14e5   : > { %v2817_v22 = vpop.f32.mrf.mxu0 }
0x14e6   : > { %v2818_v31 = vadd.f32 %v2817_v22, %v4470_v6  ;;  %v2837_v55 = vsel %vm843_vm9, %v2826_v51, -inf }
0x14e7   : > { %v3927_v26 = vpop.f32.mrf.mxu0 }
0x14e8   : > { %v2831_v54 = vsel %vm843_vm9, %v2818_v31, -inf }
0x14e9   : > { %v2820_v50 = vpop.f32.mrf.mxu0 }
0x14ea   : > { %v2821_v30 = vadd.f32 %v2820_v50, %v4475_v12 }
0x14ec   : > { %v2834_v59 = vsel %vm843_vm9, %v2821_v30, -inf }
0x1562   : > { %v2606_v16 = vpop.xlane.xlu0 %2605 }
0x1563   : > { %v2613_v33 = vsub.f32 %v2591_v8, %v2606_v16 }
0x1565   : > { %v2616_v47 = vmul.f32 1.442695, %v2613_v33 }
0x1566   : > { %v2609_v34 = vpop.xlane.xlu1 %2608  ;;  %v2612_v37 = vpop.xlane.xlu0 %2611 }
0x1567   : > { %v2614_v38 = vsub.f32 %v2594_v18, %v2609_v34  ;;  %v2615_v39 = vsub.f32 %v2599_v10, %v2612_v37 }
0x1569   : > { %v2618_v42 = vmul.f32 1.442695, %v2614_v38  ;;  %v2620_v43 = vmul.f32 1.442695, %v2615_v39  ;;  %v3513_v38 = vld [vmem:[%s4994_s8 + $0x18] sm:$0xf] }
0x156a   : > { %v2710_v39 = vsel %vm586_vm2, %v3513_v38, 0 }
0x156b   : > { %4162 = vpow2.f32 %v2618_v42 }
0x156c   : > { %4164 = vpow2.f32 %v2620_v43  ;;  %v2525_v43 = vpop.f32.mrf.mxu1 }
0x156d   : > { %4166 = vpow2.f32 %v2616_v47 }
0x1578   : > { %v4163_v44 = vpop.eup %4162 }
0x1579   : > { %v4165_v46 = vpop.eup %4164  ;;  %v2625_v28 = vsel %vm843_vm9, %v4163_v44, 0.0 }
0x157a   : > { %2626 = vadd.xlane.f32.xlu1 %v2625_v28  ;;  %v2628_v29 = vsel %vm843_vm9, %v4165_v46, 0.0  ;;  %v4167_v48 = vpop.eup %4166 }
0x157b   : > { %2629 = vadd.xlane.f32.xlu0 %v2628_v29  ;;  %v2622_v49 = vsel %vm843_vm9, %v4167_v48, 0.0 }
0x157f   : > { %2623 = vadd.xlane.f32.xlu0 %v2622_v49 }
0x158b   : > { %2641 = vrot.lane.b32.xlu1 %v4728_v14, %s5020_s27 }
0x1595   : > { %2639 = vrot.lane.b32.xlu0 %v4732_v27, %s5020_s27 }
0x15af   : > { %2832 = vmax.xlane.f32.xlu1 %v2831_v54 }
0x15b3   : > { %2838 = vmax.xlane.f32.xlu1 %v2837_v55 }
0x15b4   : > { %2835 = vmax.xlane.f32.xlu0 %v2834_v59 }
0x1603   : > { %v2627_v53 = vpop.xlane.xlu1 %2626 }
0x1604   : > { %v2630_v57 = vpop.xlane.xlu0 %2629 }
0x1605   : > { %4168 = vrcp.f32 %v2630_v57 }
0x1606   : > { %4170 = vrcp.f32 %v2627_v53 }
0x1607   : > { %v2642_v58 = vpop.permute.xlu1 %2641 }
0x1608   : > { %v2651_v6 = vsel %vm586_vm2, %v2642_v58, 0  ;;  %v2624_v60 = vpop.xlane.xlu0 %2623  ;;  %3996 = vmatprep.subr.msk.bf16.mxu1 %vm586_vm2, %v2642_v58 }
0x1609   : > { %4172 = vrcp.f32 %v2624_v60  ;;  %3907 = vmatpush3.bf16.msra.mxu1 %v2651_v6  ;;  %v3514_v6 = vld [vmem:[%s4994_s8 + $0x1c] sm:$0xf] }
0x160a   : > { %v2937_v60 = vsel %vm586_vm2, %v3514_v6, 0 }
0x160c   : > { %v2640_v4 = vpop.permute.xlu0 %2639 }
0x160d   : > { %3908 = vmatprep.subr.bf16.mxu1 %v2640_v4 }
0x160e   : > { %3909 = vmatpush3.bf16.msra.mxu1 %v2640_v4 }
0x160f   : > { %3997 = vmatprep.subr.msk.bf16.mxu1 %vm586_vm2, %v3513_v38 }
0x1612   : > { %v4169_v12 = vpop.eup %4168 }
0x1613   : > { %v4171_v35 = vpop.eup %4170  ;;  %v2636_v62 = vmul.f32 %v4169_v12, %v4165_v46 }
0x1614   : > { %v2635_v1 = vmul.f32 %v4171_v35, %v4163_v44 }
0x1615   : > { %v2638_v7 = vpack.c.bf16 %v2636_v62, %v2636_v62 }
0x1616   : > { %v4173_v61 = vpop.eup %4172 }
0x1617   : > { %v2634_v32 = vmul.f32 %v4173_v61, %v4167_v48 }
0x1619   : > { %v2637_v24 = vpack.c.bf16 %v2635_v1, %v2634_v32  ;;  %v2526_v32 = vadd.f32 %v2525_v43, %v4846_v2 }
0x161b   : > { %3910 = vmatprep.mubr.msk.bf16.mxu1 %vm843_vm9, %v2637_v24 }
0x161c   : > { %3911 = vmatmul.mubr.msk.bf16.vlgmr.msra.gmra.mxu1 %vm843_vm9, %v2638_v7 }
0x161d   : > { %3915 = vmatpush3.bf16.msra.mxu1 %v2710_v39 }
0x1638   : > { %v2833_v8 = vpop.xlane.xlu1 %2832 }
0x1639   : > { %v2840_v9 = vsub.f32 %v2818_v31, %v2833_v8 }
0x163b   : > { %v2843_v19 = vmul.f32 1.442695, %v2840_v9 }
0x163c   : > { %v2839_v10 = vpop.xlane.xlu1 %2838 }
0x163d   : > { %v2842_v11 = vsub.f32 %v2826_v51, %v2839_v10  ;;  %v2836_v13 = vpop.xlane.xlu0 %2835 }
0x163e   : > { %v2841_v18 = vsub.f32 %v2821_v30, %v2836_v13 }
0x163f   : > { %v2847_v20 = vmul.f32 1.442695, %v2842_v11 }
0x1640   : > { %v2845_v21 = vmul.f32 1.442695, %v2841_v18 }
0x1641   : > { %4174 = vpow2.f32 %v2847_v20 }
0x1642   : > { %4176 = vpow2.f32 %v2845_v21 }
0x1643   : > { %4178 = vpow2.f32 %v2843_v19 }
0x164e   : > { %v4175_v22 = vpop.eup %4174 }
0x164f   : > { %v4177_v26 = vpop.eup %4176  ;;  %v2855_v16 = vsel %vm843_vm9, %v4175_v22, 0.0 }
0x1650   : > { %v4179_v33 = vpop.eup %4178  ;;  %2856 = vadd.xlane.f32.xlu0 %v2855_v16  ;;  %v2852_v34 = vsel %vm843_vm9, %v4177_v26, 0.0 }
0x1651   : > { %2853 = vadd.xlane.f32.xlu1 %v2852_v34  ;;  %v2849_v37 = vsel %vm843_vm9, %v4179_v33, 0.0 }
0x1654   : > { %2850 = vadd.xlane.f32.xlu0 %v2849_v37 }
0x1662   : > { %2868 = vrot.lane.b32.xlu1 %v4728_v14, %s5021_s17 }
0x166a   : > { %2866 = vrot.lane.b32.xlu0 %v4732_v27, %s5021_s17 }
0x16d9   : > { %v2857_v42 = vpop.xlane.xlu0 %2856 }
0x16da   : > { %v2854_v47 = vpop.xlane.xlu1 %2853  ;;  %4180 = vrcp.f32 %v2857_v42 }
0x16db   : > { %4182 = vrcp.f32 %v2854_v47 }
0x16dc   : > { %v3912_v44 = vpop.f32.mrf.mxu1 }
0x16dd   : > { %v2851_v46 = vpop.xlane.xlu0 %2850  ;;  %v2702_v50 = vpack.c.bf16 %v3912_v44, %v3912_v44 }
0x16de   : > { %v2687_v28 = vpop.f32.mrf.mxu1  ;;  %v2869_v29 = vpop.permute.xlu1 %2868  ;;  %4184 = vrcp.f32 %v2851_v46 }
0x16df   : > { %4000 = vmatprep.subr.msk.bf16.mxu1 %vm586_vm2, %v2869_v29  ;;  %v2878_v14 = vsel %vm586_vm2, %v2869_v29, 0 }
0x16e0   : > { %v3913_v48 = vpop.f32.mrf.mxu1 }
0x16e1   : > { %v2867_v27 = vpop.permute.xlu0 %2866 }
0x16e2   : > { %v2690_v49 = vpop.f32.mrf.mxu1 }
0x16e3   : > { %v2701_v31 = vpack.c.bf16 %v2690_v49, %v2687_v28 }
0x16e5   : > { %3916 = vmatprep.mubr.msk.bf16.mxu1 %vm582_vm4, %v2701_v31 }
0x16e6   : > { %3917 = vmatmul.mubr.msk.bf16.vlgmr.msra.gmra.mxu1 %vm582_vm4, %v2702_v50 }
0x16e7   : > { %3929 = vmatpush3.bf16.msra.mxu1 %v2878_v14  ;;  %v4181_v51 = vpop.eup %4180 }
0x16e8   : > { %3930 = vmatprep.subr.bf16.mxu1 %v2867_v27  ;;  %v4183_v54 = vpop.eup %4182  ;;  %v2863_v55 = vmul.f32 %v4181_v51, %v4175_v22  ;;  %v2996_v22 = vrot.slane %v4724_v40, %v4418_v17  ;;  %v4068_v51 = vld [vmem:[%s4995_s9 + $0x18] sm:$0xff]  }
0x16e9   : > { %v2862_v53 = vmul.f32 %v4183_v54, %v4177_v26  ;;  %v4069_v54 = vld [vmem:[%s4995_s9 + $0x10] sm:$0xff]   ;;  %3942 = vmatprep.subr.bf16.mxu0 %v4068_v51 }
0x16ea   : > { %v2865_v58 = vpack.c.bf16 %v2863_v55, %v2863_v55  ;;  %3943 = vmatpush3.bf16.msra.mxu0 %v4068_v51  ;;  %v4071_v55 = vld [vmem:[%s4996_s10 + $0x70] sm:$0xff]  }
0x16eb   : > { %v4185_v30 = vpop.eup %4184  ;;  %3931 = vmatpush3.bf16.msra.mxu1 %v2867_v27  ;;  %3944 = vmatprep.subr.bf16.mxu0 %v4069_v54 }
0x16ec   : > { %v2861_v59 = vmul.f32 %v4185_v30, %v4179_v33  ;;  %4001 = vmatprep.subr.msk.bf16.mxu1 %vm586_vm2, %v3514_v6  ;;  %v4070_v30 = vld [vmem:[%s4996_s10 + $0x78] sm:$0xff]  }
0x16ee   : > { %v2864_v57 = vpack.c.bf16 %v2862_v53, %v2861_v59  ;;  %3945 = vmatpush3.bf16.msra.mxu0 %v4069_v54  ;;  %v4072_v59 = vld [vmem:[%s4996_s10 + $0x68] sm:$0xff]   ;;  %v4073_v53 = vld [vmem:[%s4996_s10 + $0x60] sm:$0xff]  }
0x16f0   : > { %3932 = vmatprep.mubr.msk.bf16.mxu1 %vm843_vm9, %v2864_v57  ;;  %v4074_v57 = vld [vmem:[%s4996_s10 + $0x58] sm:$0xff]  }
0x16f1   : > { %3933 = vmatmul.mubr.msk.bf16.vlgmr.msra.gmra.mxu1 %vm843_vm9, %v2865_v58 }
0x16f2   : > { %3937 = vmatpush3.bf16.msra.mxu1 %v2937_v60 }
0x16f3   : > { %3950 = vmatprep.subr.bf16.mxu1 %v4070_v30 }
0x17a6   : > { %v3918_v4 = vpop.f32.mrf.mxu1 }
0x17a7   : > { %v2762_v12 = vadd.f32 %v3918_v4, %v4842_v63 }
0x17a8   : > { %v2746_v35 = vpop.f32.mrf.mxu1 }
0x17a9   : > { %v2760_v61 = vadd.f32 %v2746_v35, %v4844_v0 }
0x17aa   : > { %v3919_v62 = vpop.f32.mrf.mxu1 }
0x17ac   : > { %v2749_v1 = vpop.f32.mrf.mxu1 }
0x17ad   : > { %v2761_v24 = vadd.f32 %v2749_v1, %v2526_v32 }
0x17b1   : > { %v3934_v7 = vpop.f32.mrf.mxu1 }
0x17b2   : > { %v2929_v13 = vpack.c.bf16 %v3934_v7, %v3934_v7  ;;  %v3042_v7 = vrot.slane %v4724_v40, %v1732_v36  ;;  %v4075_v36 = vld [vmem:[%s4996_s10 + $0x50] sm:$0xff]  }
0x17b3   : > { %v2914_v8 = vpop.f32.mrf.mxu1 }
0x17b5   : > { %v3935_v9 = vpop.f32.mrf.mxu1 }
0x17b7   : > { %v2917_v10 = vpop.f32.mrf.mxu1 }
0x17b8   : > { %v2928_v11 = vpack.c.bf16 %v2917_v10, %v2914_v8 }
0x17ba   : > { %3938 = vmatprep.mubr.msk.bf16.mxu1 %vm582_vm4, %v2928_v11 }
0x17bb   : > { %3939 = vmatmul.mubr.msk.bf16.vlgmr.msra.gmra.mxu1 %vm582_vm4, %v2929_v13  ;;  %v3049_v13 = vrot.slane %v4724_v40, %v1739_v41  ;;  %v4076_v41 = vld [vmem:[%s4996_s10 + $0x48] sm:$0xff]  }
0x17bc   : > { %3951 = vmatpush3.bf16.msra.mxu1 %v4070_v30 }
0x17bd   : > { %3952 = vmatprep.subr.bf16.mxu1 %v4071_v55 }
0x17c0   : > { %3953 = vmatpush3.bf16.msra.mxu1 %v4071_v55 }
0x17c1   : > { %3954 = vmatprep.subr.bf16.mxu1 %v4072_v59 }
0x17c4   : > { %3955 = vmatpush3.bf16.msra.mxu1 %v4072_v59 }
0x17c5   : > { %3956 = vmatprep.subr.bf16.mxu1 %v4073_v53 }
0x17c8   : > { %3957 = vmatpush3.bf16.msra.mxu1 %v4073_v53 }
0x17c9   : > { %3958 = vmatprep.subr.bf16.mxu1 %v4074_v57 }
0x17cc   : > { %3959 = vmatpush3.bf16.msra.mxu1 %v4074_v57 }
0x17cd   : > { %3960 = vmatprep.subr.bf16.mxu1 %v4075_v36 }
0x17d0   : > { %3961 = vmatpush3.bf16.msra.mxu1 %v4075_v36 }
0x17d1   : > { %3962 = vmatprep.subr.bf16.mxu1 %v4076_v41 }
0x17d4   : > { %3963 = vmatpush3.bf16.msra.mxu1 %v4076_v41 }
0x187b   : > { %v3940_v18 = vpop.f32.mrf.mxu1 }
0x187c   : > { %v2989_v63 = vadd.f32 %v3940_v18, %v2762_v12 }
0x187d   : > { %v2973_v19 = vpop.f32.mrf.mxu1 }
0x187e   : > { %v2987_v20 = vadd.f32 %v2973_v19, %v2760_v61  ;;  %v2992_v21 = vadd.f32 %v2989_v63, %v4709_v5 }
0x187f   : > { %v3941_v0 = vpop.f32.mrf.mxu1 }
0x1880   : > { %v2990_v2 = vadd.f32 %v2987_v20, %v4711_v45  ;;  %v2999_v38 = vadd.f32 %v2996_v22, %v2992_v21 }
0x1881   : > { %v2976_v26 = vpop.f32.mrf.mxu1 }
0x1882   : > { %v2988_v16 = vadd.f32 %v2976_v26, %v2761_v24  ;;  %v2997_v33 = vadd.f32 %v2996_v22, %v2990_v2  ;;  %v3006_v42 = vsel %vm711_vm6, %v2999_v38, 0.0  ;;  %v4077_v26 = vld [vmem:[%s4996_s10 + $0x40] sm:$0xff]  }
0x1883   : > { %3964 = vmatprep.subr.bf16.mxu1 %v4077_v26 }
0x1884   : > { %v2991_v34 = vadd.f32 %v2988_v16, %v4713_v52  ;;  %v3000_v37 = vsel %vm711_vm6, %v2997_v33, 0.0  ;;  %3965 = vmatpush3.bf16.msra.mxu1 %v4077_v26  ;;  %v3063_v16 = vrot.slane %v4724_v40, %v4427_v25 }
0x1885   : > { %3001 = vadd.xlane.f32.xlu1 %v3000_v37 }
0x1886   : > { %v2998_v39 = vadd.f32 %v2996_v22, %v2991_v34 }
0x1888   : > { %v3003_v43 = vsel %vm711_vm6, %v2998_v39, 0.0 }
0x1889   : > { %3007 = vadd.xlane.f32.xlu1 %v3006_v42  ;;  %3004 = vadd.xlane.f32.xlu0 %v3003_v43 }
0x190e   : > { %v3002_v5 = vpop.xlane.xlu1 %3001 }
0x190f   : > { %v3009_v45 = vmul.f32 0.03125, %v3002_v5 }
0x1911   : > { %v3012_v47 = vsub.f32 %v2997_v33, %v3009_v45 }
0x1912   : > { %v3008_v17 = vpop.xlane.xlu1 %3007  ;;  %v3005_v44 = vpop.xlane.xlu0 %3004 }
0x1913   : > { %v3011_v46 = vmul.f32 0.03125, %v3008_v17  ;;  %v3010_v28 = vmul.f32 0.03125, %v3005_v44  ;;  %v3015_v29 = vmul.f32 %v3012_v47, %v3012_v47 }
0x1915   : > { %v3014_v52 = vsub.f32 %v2999_v38, %v3011_v46  ;;  %v3013_v48 = vsub.f32 %v2998_v39, %v3010_v28  ;;  %v3018_v49 = vsel %vm711_vm6, %v3015_v29, 0.0  ;;  %v3155_v46 = vrot.slane %v4724_v40, %v1843_v3 }
0x1916   : > { %3019 = vadd.xlane.f32.xlu0 %v3018_v49 }
0x1917   : > { %v3017_v31 = vmul.f32 %v3014_v52, %v3014_v52  ;;  %v3016_v50 = vmul.f32 %v3013_v48, %v3013_v48 }
0x1919   : > { %v3024_v14 = vsel %vm711_vm6, %v3017_v31, 0.0  ;;  %v3021_v27 = vsel %vm711_vm6, %v3016_v50, 0.0 }
0x191a   : > { %3025 = vadd.xlane.f32.xlu0 %v3024_v14  ;;  %3022 = vadd.xlane.f32.xlu1 %v3021_v27 }
0x199f   : > { %v3020_v58 = vpop.xlane.xlu0 %3019 }
0x19a0   : > { %v3027_v6 = vmul.f32 0.03125, %v3020_v58 }
0x19a2   : > { %v3030_v60 = vadd.f32 1e-05, %v3027_v6 }
0x19a3   : > { %v3023_v4 = vpop.xlane.xlu1 %3022  ;;  %v3026_v12 = vpop.xlane.xlu0 %3025 }
0x19a4   : > { %4186 = vrsqrt.f32 %v3030_v60  ;;  %v3028_v35 = vmul.f32 0.03125, %v3023_v4  ;;  %v3029_v61 = vmul.f32 0.03125, %v3026_v12 }
0x19a6   : > { %v3031_v62 = vadd.f32 1e-05, %v3028_v35  ;;  %v3032_v32 = vadd.f32 1e-05, %v3029_v61 }
0x19a8   : > { %4188 = vrsqrt.f32 %v3031_v62 }
0x19a9   : > { %4190 = vrsqrt.f32 %v3032_v32 }
0x19b1   : > { %v4187_v1 = vpop.eup %4186 }
0x19b2   : > { %v3036_v24 = vmul.f32 %v4187_v1, %v3012_v47 }
0x19b4   : > { %v3043_v11 = vmul.f32 %v3042_v7, %v3036_v24 }
0x19b5   : > { %v4189_v8 = vpop.eup %4188 }
0x19b6   : > { %v4191_v9 = vpop.eup %4190  ;;  %v3037_v10 = vmul.f32 %v4189_v8, %v3013_v48  ;;  %v3050_v20 = vadd.f32 %v3049_v13, %v3043_v11 }
0x19b7   : > { %v3038_v18 = vmul.f32 %v4191_v9, %v3014_v52 }
0x19b8   : > { %v3044_v63 = vmul.f32 %v3042_v7, %v3037_v10 }
0x19b9   : > { %v3045_v19 = vmul.f32 %v3042_v7, %v3038_v18 }
0x19ba   : > { %v3051_v0 = vadd.f32 %v3049_v13, %v3044_v63  ;;  %v4199_v63 = vld [vmem:[%s4997_s11 + $0x8] sm:$0xff] }
0x19bb   : > { %v3052_v21 = vadd.f32 %v3049_v13, %v3045_v19  ;;  %v3297_v19 = vrot.slane %v4199_v63, %v1985_v56 }
0x19bc   : > { %v3053_v2 = vpack.c.bf16 %v3051_v0, %v3050_v20 }
0x19bd   : > { %v3054_v22 = vpack.c.bf16 %v3052_v21, %v3052_v21 }
0x19be   : > { %3946 = vmatprep.mubr.msk.bf16.mxu0 %vm711_vm6, %v3053_v2 }
0x19bf   : > { %3947 = vmatmul.mubr.msk.bf16.vlgmr.msra.gmra.mxu0 %vm711_vm6, %v3054_v22 }
0x1a7f   : > { %v3948_v33 = vpop.f32.mrf.mxu0 }
0x1a80   : > { %v3125_v37 = vadd.f32 %v3948_v33, %v3063_v16 }
0x1a81   : > { %v3116_v34 = vpop.f32.mrf.mxu0 }
0x1a82   : > { %v3117_v39 = vadd.f32 %v3116_v34, %v3063_v16  ;;  %v3132_v5 = vmax.f32 %v3125_v37, 0.0 }
0x1a83   : > { %v3949_v38 = vpop.f32.mrf.mxu0 }
0x1a84   : > { %v3130_v45 = vmax.f32 %v3117_v39, 0.0  ;;  %v3134_v44 = vpack.c.bf16 %v3132_v5, %v3132_v5 }
0x1a85   : > { %v3119_v42 = vpop.f32.mrf.mxu0 }
0x1a86   : > { %v3120_v43 = vadd.f32 %v3119_v42, %v3063_v16 }
0x1a88   : > { %v3131_v47 = vmax.f32 %v3120_v43, 0.0 }
0x1a8a   : > { %v3133_v17 = vpack.c.bf16 %v3131_v47, %v3130_v45 }
0x1a8c   : > { %3966 = vmatprep.mubr.bf16.mxu1 %v3133_v17 }
0x1a8d   : > { %3967 = vmatmul.mubr.bf16.vlgmr.msra.gmra.mxu1 %v3134_v44 }
0x1b4d   : > { %v3968_v28 = vpop.f32.mrf.mxu1 }
0x1b4e   : > { %v3247_v29 = vadd.f32 %v3968_v28, %v3155_v46 }
0x1b4f   : > { %v3238_v25 = vpop.f32.mrf.mxu1 }
0x1b50   : > { %v3239_v52 = vadd.f32 %v3238_v25, %v3155_v46  ;;  %v3254_v50 = vadd.f32 %v3247_v29, %v3052_v21 }
0x1b51   : > { %v3969_v48 = vpop.f32.mrf.mxu1 }
0x1b52   : > { %v3252_v49 = vadd.f32 %v3239_v52, %v3050_v20  ;;  %v3261_v30 = vsel %vm711_vm6, %v3254_v50, 0.0 }
0x1b53   : > { %v3241_v31 = vpop.f32.mrf.mxu1 }
0x1b54   : > { %v3242_v14 = vadd.f32 %v3241_v31, %v3155_v46  ;;  %v3255_v27 = vsel %vm711_vm6, %v3252_v49, 0.0 }
0x1b55   : > { %3256 = vadd.xlane.f32.xlu1 %v3255_v27 }
0x1b56   : > { %v3253_v51 = vadd.f32 %v3242_v14, %v3051_v0  ;;  %v3304_v0 = vrot.slane %v4199_v63, %v1992_v23 }
0x1b58   : > { %v3258_v54 = vsel %vm711_vm6, %v3253_v51, 0.0 }
0x1b59   : > { %3259 = vadd.xlane.f32.xlu0 %v3258_v54  ;;  %3262 = vadd.xlane.f32.xlu1 %v3261_v30 }
0x1bde   : > { %v3257_v3 = vpop.xlane.xlu1 %3256 }
0x1bdf   : > { %v3264_v40 = vmul.f32 0.03125, %v3257_v3 }
0x1be1   : > { %v3267_v55 = vsub.f32 %v3252_v49, %v3264_v40 }
0x1be2   : > { %v3260_v59 = vpop.xlane.xlu0 %3259  ;;  %v3263_v53 = vpop.xlane.xlu1 %3262 }
0x1be3   : > { %v3265_v57 = vmul.f32 0.03125, %v3260_v59  ;;  %v3266_v58 = vmul.f32 0.03125, %v3263_v53  ;;  %v3270_v6 = vmul.f32 %v3267_v55, %v3267_v55 }
0x1be5   : > { %v3268_v60 = vsub.f32 %v3253_v51, %v3265_v57  ;;  %v3269_v4 = vsub.f32 %v3254_v50, %v3266_v58  ;;  %v3273_v12 = vsel %vm711_vm6, %v3270_v6, 0.0 }
0x1be6   : > { %3274 = vadd.xlane.f32.xlu0 %v3273_v12 }
0x1be7   : > { %v3271_v35 = vmul.f32 %v3268_v60, %v3268_v60  ;;  %v3272_v61 = vmul.f32 %v3269_v4, %v3269_v4 }
0x1be9   : > { %v3276_v62 = vsel %vm711_vm6, %v3271_v35, 0.0  ;;  %v3279_v32 = vsel %vm711_vm6, %v3272_v61, 0.0 }
0x1bea   : > { %3277 = vadd.xlane.f32.xlu1 %v3276_v62  ;;  %3280 = vadd.xlane.f32.xlu0 %v3279_v32 }
0x1c6f   : > { %v3275_v1 = vpop.xlane.xlu0 %3274 }
0x1c70   : > { %v3282_v24 = vmul.f32 0.03125, %v3275_v1 }
0x1c72   : > { %v3285_v7 = vadd.f32 1e-05, %v3282_v24 }
0x1c73   : > { %v3281_v8 = vpop.xlane.xlu0 %3280  ;;  %v3278_v9 = vpop.xlane.xlu1 %3277 }
0x1c74   : > { %4192 = vrsqrt.f32 %v3285_v7  ;;  %v3284_v10 = vmul.f32 0.03125, %v3281_v8  ;;  %v3283_v11 = vmul.f32 0.03125, %v3278_v9 }
0x1c76   : > { %v3287_v13 = vadd.f32 1e-05, %v3284_v10  ;;  %v3286_v18 = vadd.f32 1e-05, %v3283_v11 }
0x1c78   : > { %4194 = vrsqrt.f32 %v3287_v13 }
0x1c79   : > { %4196 = vrsqrt.f32 %v3286_v18 }
0x1c81   : > { %v4193_v20 = vpop.eup %4192 }
0x1c82   : > { %v3291_v21 = vmul.f32 %v4193_v20, %v3267_v55 }
0x1c84   : > { %v3298_v2 = vmul.f32 %v3297_v19, %v3291_v21 }
0x1c85   : > { %v4195_v22 = vpop.eup %4194 }
0x1c86   : > { %v4197_v36 = vpop.eup %4196  ;;  %v3305_v41 = vadd.f32 %v3304_v0, %v3298_v2  ;;  %v3293_v26 = vmul.f32 %v4195_v22, %v3269_v4 }
0x1c87   : > { %v3292_v16 = vmul.f32 %v4197_v36, %v3268_v60 }
0x1c88   : > { %3308 = vst.msk [vmem:[%s439_s21] sm:$0xff] %vm711_vm6, %v3305_v41  ;;  %v3300_v33 = vmul.f32 %v3297_v19, %v3293_v26 }
0x1c89   : > { %v3299_v34 = vmul.f32 %v3297_v19, %v3292_v16  ;;  %3317 = sbr.rel (!%p4359_p4) target bundleno = 7318 (0x1c96), region = 76 }
0x1c8a   : > { %v3307_v37 = vadd.f32 %v3304_v0, %v3300_v33 }
0x1c8b   : > { %v3306_v38 = vadd.f32 %v3304_v0, %v3299_v34 }
0x1c8c   : > { %3310 = vst.msk [vmem:[%s439_s21 + $0x10] sm:$0xff] %vm711_vm6, %v3307_v37 }
0x1c8d   : > { %3309 = vst.msk [vmem:[%s439_s21 + $0x8] sm:$0xff] %vm711_vm6, %v3306_v38 }
0x1c8f   : > { %v3352_v15 = vld [vmem:[%s439_s21] sm:$0xff] }
0x1c90   : > { %3353 = vst [vmem:[%s3319_s19] sm:$0xff] %v3352_v15 }
0x1c93   : > { %v3356_v23 = vld [vmem:[%s439_s21 + $0x10] sm:$0xff] }
0x1c94   : > { %v3354_v56 = vld [vmem:[%s439_s21 + $0x8] sm:$0xff]  ;;  %3357 = vst [vmem:[%s3319_s19 + $0x20] sm:$0xff] %v3356_v23 }
0x1c95   : > { %3355 = vst [vmem:[%s3319_s19 + $0x10] sm:$0xff] %v3354_v56 }
0x1c96 PF: > { %p20_p6 = scmp.ge.s32.totalorder %s4349_s25, 4   ;;  %s5022_s21 = smov %s4248_s22 }
0x1c97   : > { %s5023_s22 = smov %s4357_s28  ;;  %s5024_s23 = smov %s4349_s25 }
0x1c98   :  { %22 = sbr.rel (!%p20_p6) target bundleno = 2 (0x2), region = 152 }
0x1c9d   :  { %3373 = vsyncpa [#allocation3], 1 }
0x1c9e   :  { %3375 = vsyncpa [#allocation3 + $0x1], 1 }

</bundles_post_ra>
